<compile_context>
chip_gen: v5e
topology: v5e:2x2
jax: 0.10.0
libtpu: 0.0.40
codegen_flags: <defaults>
</compile_context>

<pallas_src>
import functools

import jax
import jax.numpy as jnp
import numpy as np
from jax import lax
from jax.experimental import pallas as pl
from jax.experimental.pallas import tpu as pltpu

EMBED_DIM = 300   # hard-coded in the torch module's __init__
HIDDEN_DIM = 768  # hard-coded in the torch module's __init__

_RA_OFF = 128     # root-affix features live in lanes [128, 256) of the fused s/r proj
F_SR = 256        # fused fc_s + fc_r output width (lane-padded)

_DN_NT = (((1,), (1,)), ((), ()))   # contract last dims: [M,K] x [N,K] -> [M,N]


def _round_up(x, m):
    return (x + m - 1) // m * m


def _vmem_limit(step_bytes):
    """Scoped-VMEM request: double-buffered block footprint + slack, clamped so the
    request is valid on every generation (v5e/v6e 128 MiB physical, v7x 64 MiB)."""
    return int(min(max(2 * step_bytes + (2 << 20), 4 << 20), 32 << 20))


def _prologue_kernel(h_ref, h1_ref, wsr_ref, bsr_ref, wfl_ref, bfl_ref,
                     semra_ref, vdlex_ref, *, s_real):
    """S-tiled pass: fused fc_s/fc_r projection + running max over the sequence,
    plus the fused fc/fc_l projection of the CLS token (done once at tile 0)."""
    si = pl.program_id(0)
    hb = h_ref[...]                                        # [Bp, tS, H] bf16
    bp, ts, hd = hb.shape
    pos = jnp.dot(hb.reshape(bp * ts, hd), wsr_ref[...],
                  preferred_element_type=jnp.float32) + bsr_ref[...]
    pos = pos.reshape(bp, ts, -1)
    # Mask sequence-padding rows so they never win the max.
    row = si * ts + lax.broadcasted_iota(jnp.int32, (1, ts, 1), 1)
    pos = jnp.where(row < s_real, pos, -1e30)
    tile_max = jnp.max(pos, axis=1)                        # [Bp, F_SR]

    @pl.when(si == 0)
    def _():
        semra_ref[...] = tile_max
        # embedding_dropout(p=0.2) is identity in eval mode.
        vdlex_ref[...] = (jnp.dot(h1_ref[...], wfl_ref[...],
                                  preferred_element_type=jnp.float32)
                          + bfl_ref[...])

    @pl.when(si > 0)
    def _():
        semra_ref[...] = jnp.maximum(semra_ref[...], tile_max)


def _score_kernel(semra_ref, vdlex_ref, emb_ref, ws_ref, wr_ref, wl_ref,
                  base_ref, psum_ref):
    """C-tiled pass: base score for this class tile + running per-branch sums
    (the global means are applied in the epilogue)."""
    ci = pl.program_id(0)
    e_pad = vdlex_ref.shape[1] - 128
    sem = semra_ref[:, :128].astype(jnp.bfloat16)
    ra = semra_ref[:, 128:].astype(jnp.bfloat16)
    vd = vdlex_ref[:, :e_pad].astype(jnp.bfloat16)
    lex = vdlex_ref[:, e_pad:].astype(jnp.bfloat16)

    # Class-dim weights stay in their stored [C, K] layout; contract K directly.
    score0 = lax.dot_general(vd, emb_ref[...], _DN_NT,
                             preferred_element_type=jnp.float32)
    ss = jnp.maximum(lax.dot_general(sem, ws_ref[...], _DN_NT,
                                     preferred_element_type=jnp.float32), 0.0)
    sr = jnp.maximum(lax.dot_general(ra, wr_ref[...], _DN_NT,
                                     preferred_element_type=jnp.float32), 0.0)
    sl = jnp.maximum(lax.dot_general(lex, wl_ref[...], _DN_NT,
                                     preferred_element_type=jnp.float32), 0.0)
    base_ref[...] = score0 + ss + sr + sl

    bp = ss.shape[0]
    sums = jnp.concatenate(
        [jnp.broadcast_to(jnp.sum(ss, axis=1, keepdims=True), (bp, 128)),
         jnp.broadcast_to(jnp.sum(sr, axis=1, keepdims=True), (bp, 128)),
         jnp.broadcast_to(jnp.sum(sl, axis=1, keepdims=True), (bp, 128))], axis=1)

    @pl.when(ci == 0)
    def _():
        psum_ref[...] = sums

    @pl.when(ci > 0)
    def _():
        psum_ref[...] = psum_ref[...] + sums


def _epilogue_kernel(base_ref, psum_ref, msk_ref, out_ref, *, class_num):
    """C-tiled pass: add mean(score_branch) * mask_branch to the base score."""
    inv = 1.0 / class_num
    psum = psum_ref[...]
    # Each 128-lane slab holds a lane-replicated per-batch sum; max extracts it.
    mean_s = jnp.max(psum[:, 0:128], axis=1, keepdims=True) * inv
    mean_r = jnp.max(psum[:, 128:256], axis=1, keepdims=True) * inv
    mean_l = jnp.max(psum[:, 256:384], axis=1, keepdims=True) * inv
    m = msk_ref[...]
    out_ref[...] = (base_ref[...]
                    + mean_s * m[0:1, :]
                    + mean_r * m[1:2, :]
                    + mean_l * m[2:3, :])


def encoder_forward(h, params, class_num, ws, wl, wr, msk_s, msk_l, msk_r,
                    *, c_tile=512, s_tile=128):
    """operation='test', mode='slr' forward of the head (3 Pallas calls)."""
    B, S, H = h.shape
    E = EMBED_DIM
    Sm = params["fc_s_w"].shape[0]
    L = params["fc_l_w"].shape[0]
    R = params["fc_r_w"].shape[0]
    assert Sm <= 128 and R <= 128 and L <= 128 and E == EMBED_DIM

    f32, bf16 = jnp.float32, jnp.bfloat16
    B_pad = _round_up(max(B, 8), 8)
    tS = min(s_tile, _round_up(S, 8))
    S_pad = _round_up(S, tS)
    tC = min(c_tile, _round_up(class_num, 128))
    C_pad = _round_up(class_num, tC)
    E_pad = _round_up(E, 128)          # 384
    F_FL = E_pad + 128                 # vd in lanes [0, E_pad), lex in [E_pad, F_FL)

    # --- one-time weight packing (would be done offline for a real checkpoint) ---
    w_sr = jnp.zeros((H, F_SR), f32)
    w_sr = w_sr.at[:, :Sm].set(params["fc_s_w"].T)
    w_sr = w_sr.at[:, _RA_OFF:_RA_OFF + R].set(params["fc_r_w"].T)
    b_sr = jnp.zeros((1, F_SR), f32)
    b_sr = b_sr.at[0, :Sm].set(params["fc_s_b"])
    b_sr = b_sr.at[0, _RA_OFF:_RA_OFF + R].set(params["fc_r_b"])
    w_fl = jnp.zeros((H, F_FL), f32)
    w_fl = w_fl.at[:, :E].set(params["fc_w"].T)
    w_fl = w_fl.at[:, E_pad:E_pad + L].set(params["fc_l_w"].T)
    b_fl = jnp.zeros((1, F_FL), f32)
    b_fl = b_fl.at[0, :E].set(params["fc_b"])
    b_fl = b_fl.at[0, E_pad:E_pad + L].set(params["fc_l_b"])

    def pad2(x, rows, cols):
        return jnp.pad(x, ((0, rows - x.shape[0]), (0, cols - x.shape[1])))

    # Class-dim weights: stored [C, K] layout, zero-padded, cast to bf16 (no .T).
    emb_c = pad2(params["emb"][:class_num], C_pad, E_pad).astype(bf16)
    ws_p = pad2(ws, C_pad, 128).astype(bf16)
    wr_p = pad2(wr, C_pad, 128).astype(bf16)
    wl_p = pad2(wl, C_pad, 128).astype(bf16)
    msk = jnp.zeros((3, C_pad), f32)
    msk = msk.at[0, :class_num].set(msk_s)
    msk = msk.at[1, :class_num].set(msk_r)
    msk = msk.at[2, :class_num].set(msk_l)

    # --- activations (bf16 feed, f32 accumulation inside the kernels) ---
    h_p = jnp.zeros((B_pad, S_pad, H), bf16).at[:B, :S].set(h.astype(bf16))
    h1_p = jnp.zeros((B_pad, H), bf16).at[:B].set(h[:, 0, :].astype(bf16))

    num_s = S_pad // tS
    num_c = C_pad // tC

    # ---------------- pass 1: S-tiled projections + running max -----------------
    pro_bytes = (B_pad * tS * H * 2 + B_pad * H * 2
                 + H * F_SR * 2 + F_SR * 4 + H * F_FL * 2 + F_FL * 4
                 + B_pad * (F_SR + F_FL) * 4)
    sem_ra, vd_lex = pl.pallas_call(
        functools.partial(_prologue_kernel, s_real=S),
        grid=(num_s,),
        in_specs=[
            pl.BlockSpec((B_pad, tS, H), lambda si: (0, si, 0)),
            pl.BlockSpec((B_pad, H), lambda si: (0, 0)),
            pl.BlockSpec((H, F_SR), lambda si: (0, 0)),
            pl.BlockSpec((1, F_SR), lambda si: (0, 0)),
            pl.BlockSpec((H, F_FL), lambda si: (0, 0)),
            pl.BlockSpec((1, F_FL), lambda si: (0, 0)),
        ],
        out_specs=(
            pl.BlockSpec((B_pad, F_SR), lambda si: (0, 0)),
            pl.BlockSpec((B_pad, F_FL), lambda si: (0, 0)),
        ),
        out_shape=(
            jax.ShapeDtypeStruct((B_pad, F_SR), f32),
            jax.ShapeDtypeStruct((B_pad, F_FL), f32),
        ),
        compiler_params=pltpu.CompilerParams(
            dimension_semantics=("arbitrary",),           # running max over S
            vmem_limit_bytes=_vmem_limit(pro_bytes)),
    )(h_p, h1_p, w_sr.astype(bf16), b_sr, w_fl.astype(bf16), b_fl)

    # ---------------- pass 2: C-tiled scores + per-branch sums ------------------
    main_bytes = (B_pad * (F_SR + F_FL) * 4 + tC * E_pad * 2 + 3 * tC * 128 * 2
                  + B_pad * tC * 4 + B_pad * 384 * 4)
    base, psum = pl.pallas_call(
        _score_kernel,
        grid=(num_c,),
        in_specs=[
            pl.BlockSpec((B_pad, F_SR), lambda ci: (0, 0)),
            pl.BlockSpec((B_pad, F_FL), lambda ci: (0, 0)),
            pl.BlockSpec((tC, E_pad), lambda ci: (ci, 0)),
            pl.BlockSpec((tC, 128), lambda ci: (ci, 0)),
            pl.BlockSpec((tC, 128), lambda ci: (ci, 0)),
            pl.BlockSpec((tC, 128), lambda ci: (ci, 0)),
        ],
        out_specs=(
            pl.BlockSpec((B_pad, tC), lambda ci: (0, ci)),
            pl.BlockSpec((B_pad, 384), lambda ci: (0, 0)),
        ),
        out_shape=(
            jax.ShapeDtypeStruct((B_pad, C_pad), f32),
            jax.ShapeDtypeStruct((B_pad, 384), f32),
        ),
        compiler_params=pltpu.CompilerParams(
            dimension_semantics=("arbitrary",),   # psum accumulated across C tiles
            vmem_limit_bytes=_vmem_limit(main_bytes)),
    )(sem_ra, vd_lex, emb_c, ws_p, wr_p, wl_p)

    # ---------------- pass 3: epilogue, apply global mean * mask ----------------
    epi_bytes = 2 * B_pad * tC * 4 + B_pad * 384 * 4 + 3 * tC * 4
    score = pl.pallas_call(
        functools.partial(_epilogue_kernel, class_num=class_num),
        grid=(num_c,),
        in_specs=[
            pl.BlockSpec((B_pad, tC), lambda ci: (0, ci)),
            pl.BlockSpec((B_pad, 384), lambda ci: (0, 0)),
            pl.BlockSpec((3, tC), lambda ci: (0, ci)),
        ],
        out_specs=pl.BlockSpec((B_pad, tC), lambda ci: (0, ci)),
        out_shape=jax.ShapeDtypeStruct((B_pad, C_pad), f32),
        compiler_params=pltpu.CompilerParams(
            dimension_semantics=("parallel",),
            vmem_limit_bytes=_vmem_limit(epi_bytes)),
    )(base, psum, msk)

    return score[:B, :class_num]


def _reference(h, params, class_num, ws, wl, wr, msk_s, msk_l, msk_r):
    """Pure-JAX reference mirroring the torch forward (test / mode='slr')."""
    h1 = h[:, 0, :]
    vd = h1 @ params["fc_w"].T + params["fc_b"]
    score = vd @ params["emb"][:class_num].T
    pos_s = h @ params["fc_s_w"].T + params["fc_s_b"]
    sem = jnp.max(pos_s, axis=1)
    score_s = jnp.maximum(sem @ ws.T, 0.0)
    score_s = score_s + jnp.mean(score_s, axis=1, keepdims=True) * msk_s[None, :]
    score = score + score_s
    pos_r = h @ params["fc_r_w"].T + params["fc_r_b"]
    ra = jnp.max(pos_r, axis=1)
    score_r = jnp.maximum(ra @ wr.T, 0.0)
    score_r = score_r + jnp.mean(score_r, axis=1, keepdims=True) * msk_r[None, :]
    score = score + score_r
    lex = h1 @ params["fc_l_w"].T + params["fc_l_b"]
    score_l = jnp.maximum(lex @ wl.T, 0.0)
    score_l = score_l + jnp.mean(score_l, axis=1, keepdims=True) * msk_l[None, :]
    score = score + score_l
    return score


if __name__ == "__main__":
    # Small, module-consistent shapes.
    B, S = 2, 8
    vocab_size, class_num = 50, 32
    sememe_num, lexname_num, rootaffix_num = 24, 20, 16
    E, H = EMBED_DIM, HIDDEN_DIM

    key = jax.random.PRNGKey(0)
    keys = jax.random.split(key, 16)

    emb = jax.random.normal(keys[0], (vocab_size, E), jnp.float32) * 0.1
    emb = emb.at[0].set(0.0)  # padding_idx=0
    params = {
        "emb": emb,
        "fc_w": jax.random.normal(keys[1], (E, H), jnp.float32) * 0.02,
        "fc_b": jax.random.normal(keys[2], (E,), jnp.float32) * 0.01,
        "fc_s_w": jax.random.normal(keys[3], (sememe_num, H), jnp.float32) * 0.02,
        "fc_s_b": jax.random.normal(keys[4], (sememe_num,), jnp.float32) * 0.01,
        "fc_l_w": jax.random.normal(keys[5], (lexname_num, H), jnp.float32) * 0.02,
        "fc_l_b": jax.random.normal(keys[6], (lexname_num,), jnp.float32) * 0.01,
        "fc_r_w": jax.random.normal(keys[7], (rootaffix_num, H), jnp.float32) * 0.02,
        "fc_r_b": jax.random.normal(keys[8], (rootaffix_num,), jnp.float32) * 0.01,
    }
    ws = jax.random.normal(keys[9], (class_num, sememe_num), jnp.float32) * 0.1
    wl = jax.random.normal(keys[10], (class_num, lexname_num), jnp.float32) * 0.1
    wr = jax.random.normal(keys[11], (class_num, rootaffix_num), jnp.float32) * 0.1
    msk_s = (jax.random.uniform(keys[12], (class_num,)) > 0.5).astype(jnp.float32)
    msk_l = (jax.random.uniform(keys[13], (class_num,)) > 0.5).astype(jnp.float32)
    msk_r = (jax.random.uniform(keys[14], (class_num,)) > 0.5).astype(jnp.float32)

    # Token ids; position 0 is the CLS-like token (always > 0), tail may be padding.
    x = jax.random.randint(keys[15], (B, S), 1, vocab_size)
    x = x.at[:, -2:].set(0)
    attention_mask = (x > 0).astype(jnp.int32)

    # Synthetic external encoder (plain-JAX glue standing in for BERT).
    tok_hidden = jax.random.normal(jax.random.PRNGKey(42), (vocab_size, H),
                                   jnp.float32) * 0.1
    h = jnp.tanh(jnp.take(tok_hidden, x, axis=0)) \
        * attention_mask.astype(jnp.float32)[..., None]

    score = encoder_forward(h, params, class_num, ws, wl, wr, msk_s, msk_l, msk_r)
    score = jax.block_until_ready(score)

    # Reference in f32 on bf16-quantized inputs (mirrors the kernel's bf16 feeds).
    def q(a):
        return a.astype(jnp.bfloat16).astype(jnp.float32)

    params_q = dict(params)
    for k_ in ("emb", "fc_w", "fc_s_w", "fc_l_w", "fc_r_w"):
        params_q[k_] = q(params[k_])
    score_ref = _reference(q(h), params_q, class_num, q(ws), q(wl), q(wr),
                           msk_s, msk_l, msk_r)
    np.testing.assert_allclose(np.asarray(score), np.asarray(score_ref),
                               rtol=2e-2, atol=2e-2)
    print("KERNEL_OK")
</pallas_src>

<mosaic_0001>
module attributes {stable_mosaic.version = 11 : i64} {
  func.func @_prologue_kernel(%arg0: i32, %arg1: memref<8x8x768xbf16, #tpu.memory_space<vmem>>, %arg2: memref<8x768xbf16, #tpu.memory_space<vmem>>, %arg3: memref<768x256xbf16, #tpu.memory_space<vmem>>, %arg4: memref<1x256xf32, #tpu.memory_space<vmem>>, %arg5: memref<768x512xbf16, #tpu.memory_space<vmem>>, %arg6: memref<1x512xf32, #tpu.memory_space<vmem>>, %arg7: memref<8x256xf32, #tpu.memory_space<vmem>>, %arg8: memref<8x512xf32, #tpu.memory_space<vmem>>) attributes {dimension_semantics = [#tpu.dimension_semantics<arbitrary>], iteration_bounds = array<i64: 1>, scalar_prefetch = 0 : i64, scratch_operands = 0 : i64, tpu.core_type = #tpu.core_type<tc>, window_params = [{transform_indices = @transform_0, window_bounds = array<i64: 8, 8, 768>}, {pipeline_mode = #tpu.pipeline_mode<synchronous>, transform_indices = @transform_1, window_bounds = array<i64: 8, 768>}, {pipeline_mode = #tpu.pipeline_mode<synchronous>, transform_indices = @transform_2, window_bounds = array<i64: 768, 256>}, {pipeline_mode = #tpu.pipeline_mode<synchronous>, transform_indices = @transform_3, window_bounds = array<i64: 1, 256>}, {pipeline_mode = #tpu.pipeline_mode<synchronous>, transform_indices = @transform_4, window_bounds = array<i64: 768, 512>}, {pipeline_mode = #tpu.pipeline_mode<synchronous>, transform_indices = @transform_5, window_bounds = array<i64: 1, 512>}, {pipeline_mode = #tpu.pipeline_mode<synchronous>, transform_indices = @transform_6, window_bounds = array<i64: 8, 256>}, {pipeline_mode = #tpu.pipeline_mode<synchronous>, transform_indices = @transform_7, window_bounds = array<i64: 8, 512>}]} {
    %c0 = arith.constant 0 : index
    %c0_0 = arith.constant 0 : index
    %c0_1 = arith.constant 0 : index
    %0 = vector.load %arg1[%c0, %c0_0, %c0_1] : memref<8x8x768xbf16, #tpu.memory_space<vmem>>, vector<8x8x768xbf16>
    %1 = vector.shape_cast %0 : vector<8x8x768xbf16> to vector<64x768xbf16>
    %c0_2 = arith.constant 0 : index
    %c0_3 = arith.constant 0 : index
    %2 = vector.load %arg3[%c0_2, %c0_3] : memref<768x256xbf16, #tpu.memory_space<vmem>>, vector<768x256xbf16>
    %cst = arith.constant dense<0.000000e+00> : vector<64x256xf32>
    %3 = tpu.matmul %1, %2, %cst {dimension_numbers = #tpu.dot_dimension_numbers<[1], [0], [0], [1], [0, 0, 1, 1], [], []>} : vector<64x768xbf16>, vector<768x256xbf16>, vector<64x256xf32> -> vector<64x256xf32>
    %c0_4 = arith.constant 0 : index
    %c0_5 = arith.constant 0 : index
    %4 = vector.load %arg4[%c0_4, %c0_5] : memref<1x256xf32, #tpu.memory_space<vmem>>, vector<1x256xf32>
    %5 = vector.broadcast %4 : vector<1x256xf32> to vector<64x256xf32>
    %6 = arith.addf %3, %5 : vector<64x256xf32>
    %7 = vector.shape_cast %6 : vector<64x256xf32> to vector<8x8x256xf32>
    %c8_i32 = arith.constant 8 : i32
    %8 = arith.muli %arg0, %c8_i32 : i32
    %9 = tpu.iota {dimensions = array<i32: 1>} : vector<1x8x1xi32>
    %10 = vector.broadcast %8 : i32 to vector<1x8x1xi32>
    %11 = arith.addi %10, %9 : vector<1x8x1xi32>
    %c8_i32_6 = arith.constant 8 : i32
    %12 = vector.broadcast %c8_i32_6 : i32 to vector<1x8x1xi32>
    %13 = arith.cmpi slt, %11, %12 : vector<1x8x1xi32>
    %cst_7 = arith.constant -1.000000e+30 : f32
    %14 = vector.shape_cast %13 : vector<1x8x1xi1> to vector<1x8x1xi1>
    %15 = vector.broadcast %14 : vector<1x8x1xi1> to vector<8x8x256xi1>
    %16 = vector.broadcast %cst_7 : f32 to vector<8x8x256xf32>
    %17 = arith.select %15, %7, %16 : vector<8x8x256xi1>, vector<8x8x256xf32>
    %cst_8 = arith.constant dense<0xFF800000> : vector<8x256xf32>
    %18 = vector.multi_reduction <maximumf>, %17, %cst_8 [1] : vector<8x8x256xf32> to vector<8x256xf32>
    %c0_i32 = arith.constant 0 : i32
    %19 = arith.cmpi eq, %arg0, %c0_i32 : i32
    %20 = arith.extui %19 : i1 to i32
    %c0_i32_9 = arith.constant 0 : i32
    %21 = arith.cmpi ne, %20, %c0_i32_9 : i32
    scf.if %21 {
      %c0_12 = arith.constant 0 : index
      %c0_13 = arith.constant 0 : index
      %25 = vector.load %arg7[%c0_12, %c0_13] : memref<8x256xf32, #tpu.memory_space<vmem>>, vector<8x256xf32>
      tpu.vector_store %arg7[%c0_12, %c0_13], %18 {strides = array<i32>} : memref<8x256xf32, #tpu.memory_space<vmem>>, vector<8x256xf32>,
      %c0_14 = arith.constant 0 : index
      %c0_15 = arith.constant 0 : index
      %26 = vector.load %arg2[%c0_14, %c0_15] : memref<8x768xbf16, #tpu.memory_space<vmem>>, vector<8x768xbf16>
      %c0_16 = arith.constant 0 : index
      %c0_17 = arith.constant 0 : index
      %27 = vector.load %arg5[%c0_16, %c0_17] : memref<768x512xbf16, #tpu.memory_space<vmem>>, vector<768x512xbf16>
      %cst_18 = arith.constant dense<0.000000e+00> : vector<8x512xf32>
      %28 = tpu.matmul %26, %27, %cst_18 {dimension_numbers = #tpu.dot_dimension_numbers<[1], [0], [0], [1], [0, 0, 1, 1], [], []>} : vector<8x768xbf16>, vector<768x512xbf16>, vector<8x512xf32> -> vector<8x512xf32>
      %c0_19 = arith.constant 0 : index
      %c0_20 = arith.constant 0 : index
      %29 = vector.load %arg6[%c0_19, %c0_20] : memref<1x512xf32, #tpu.memory_space<vmem>>, vector<1x512xf32>
      %30 = vector.broadcast %29 : vector<1x512xf32> to vector<8x512xf32>
      %31 = arith.addf %28, %30 : vector<8x512xf32>
      %c0_21 = arith.constant 0 : index
      %c0_22 = arith.constant 0 : index
      %32 = vector.load %arg8[%c0_21, %c0_22] : memref<8x512xf32, #tpu.memory_space<vmem>>, vector<8x512xf32>
      tpu.vector_store %arg8[%c0_21, %c0_22], %31 {strides = array<i32>} : memref<8x512xf32, #tpu.memory_space<vmem>>, vector<8x512xf32>,
    } else {
    }
    %c0_i32_10 = arith.constant 0 : i32
    %22 = arith.cmpi sgt, %arg0, %c0_i32_10 : i32
    %23 = arith.extui %22 : i1 to i32
    %c0_i32_11 = arith.constant 0 : i32
    %24 = arith.cmpi ne, %23, %c0_i32_11 : i32
    scf.if %24 {
      %c0_12 = arith.constant 0 : index
      %c0_13 = arith.constant 0 : index
      %25 = vector.load %arg7[%c0_12, %c0_13] : memref<8x256xf32, #tpu.memory_space<vmem>>, vector<8x256xf32>
      %26 = arith.maximumf %25, %18 : vector<8x256xf32>
      %c0_14 = arith.constant 0 : index
      %c0_15 = arith.constant 0 : index
      %27 = vector.load %arg7[%c0_14, %c0_15] : memref<8x256xf32, #tpu.memory_space<vmem>>, vector<8x256xf32>
      tpu.vector_store %arg7[%c0_14, %c0_15], %26 {strides = array<i32>} : memref<8x256xf32, #tpu.memory_space<vmem>>, vector<8x256xf32>,
    } else {
    }
    return
  }
  func.func @transform_0(%arg0: i32) -> (i32, i32, i32) {
    %c0_i32 = arith.constant 0 : i32
    %c0_i32_0 = arith.constant 0 : i32
    %c0_i32_1 = arith.constant 0 : i32
    return %c0_i32, %arg0, %c0_i32_0 : i32, i32, i32
  }
  func.func @transform_1(%arg0: i32) -> (i32, i32) {
    %c0_i32 = arith.constant 0 : i32
    %c0_i32_0 = arith.constant 0 : i32
    %c0_i32_1 = arith.constant 0 : i32
    return %c0_i32, %c0_i32_0 : i32, i32
  }
  func.func @transform_2(%arg0: i32) -> (i32, i32) {
    %c0_i32 = arith.constant 0 : i32
    %c0_i32_0 = arith.constant 0 : i32
    %c0_i32_1 = arith.constant 0 : i32
    return %c0_i32, %c0_i32_0 : i32, i32
  }
  func.func @transform_3(%arg0: i32) -> (i32, i32) {
    %c0_i32 = arith.constant 0 : i32
    %c0_i32_0 = arith.constant 0 : i32
    %c0_i32_1 = arith.constant 0 : i32
    return %c0_i32, %c0_i32_0 : i32, i32
  }
  func.func @transform_4(%arg0: i32) -> (i32, i32) {
    %c0_i32 = arith.constant 0 : i32
    %c0_i32_0 = arith.constant 0 : i32
    %c0_i32_1 = arith.constant 0 : i32
    return %c0_i32, %c0_i32_0 : i32, i32
  }
  func.func @transform_5(%arg0: i32) -> (i32, i32) {
    %c0_i32 = arith.constant 0 : i32
    %c0_i32_0 = arith.constant 0 : i32
    %c0_i32_1 = arith.constant 0 : i32
    return %c0_i32, %c0_i32_0 : i32, i32
  }
  func.func @transform_6(%arg0: i32) -> (i32, i32) {
    %c0_i32 = arith.constant 0 : i32
    %c0_i32_0 = arith.constant 0 : i32
    %c0_i32_1 = arith.constant 0 : i32
    return %c0_i32, %c0_i32_0 : i32, i32
  }
  func.func @transform_7(%arg0: i32) -> (i32, i32) {
    %c0_i32 = arith.constant 0 : i32
    %c0_i32_0 = arith.constant 0 : i32
    %c0_i32_1 = arith.constant 0 : i32
    return %c0_i32, %c0_i32_0 : i32, i32
  }
}

</mosaic_0001>

<bundles_post_ra>
// kernel: tpu_custom_call.1
= control target key start
LH: loop header
LB: loop body
LE: loop exit
PB: predicated region body
PF: predicated region fallthrough
CT: control target
= control target key end

     0   :  { %13 = vsyncpa [#allocation3], 0  ;;  %s5008_s0 = inlined_call_operand.hbm [shape: bf16[8,8,768], index: 0, kind: input, shape index: {}]   ;;  %s5009_s1 = inlined_call_operand.hbm [shape: bf16[8,768], index: 1, kind: input, shape index: {}]   ;;  %s5010_s2 = inlined_call_operand.hbm [shape: bf16[768,256], index: 2, kind: input, shape index: {}]   ;;  %s5011_s3 = inlined_call_operand.hbm [shape: f32[1,256], index: 3, kind: input, shape index: {}]   ;;  %s5012_s4 = inlined_call_operand.hbm [shape: bf16[768,512], index: 4, kind: input, shape index: {}]   ;;  %s5013_s5 = inlined_call_operand.vmem [shape: f32[1,512], index: 5, kind: input, shape index: {}]   ;;  %s5014_s6 = inlined_call_operand.hbm [shape: f32[8,256], index: 6, kind: output, shape index: {0}]   ;;  %s5015_s7 = inlined_call_operand.hbm [shape: f32[8,512], index: 7, kind: output, shape index: {1}]  }
   0x1   :  { %14 = vsyncpa [#allocation6], 0 }
   0x2   :  { %15 = vsyncpa [#allocation9], 0 }
   0x3   :  { %16 = vsyncpa [#allocation4], 0  ;;  %s36_s26 = sshll.u32 %s5009_s1, 4  ;;  %s37_s26 = int_to_ptr.hbm [resolvable:$true] %s36_s26 }
   0x4   :  { %17 = vsyncpa [#allocation13], 0  ;;  %s4677_s27 = smov [#allocation5]   ;;  %s60_s8 = sshll.u32 %s5011_s3, 4  ;;  %s61_s8 = int_to_ptr.hbm [resolvable:$true] %s60_s8 }
   0x5   :  { %s38_s28 = sshll.u32 %s4677_s27, 4  ;;  %s4678_s9 = smov [#allocation8]   ;;  %s39_s28 = int_to_ptr.vmem [resolvable:$true] %s38_s28 }
   0x6   :  { %41 = dma.hbm_to_vmem [thread:$0]  %s37_s26, 384, %s39_s28, [#allocation6]  }
   0x7   :  { %s62_s10 = sshll.u32 %s4678_s9, 4  ;;  %s22_s13 = sshll.u32 %s5008_s0, 4  ;;  %s63_s10 = int_to_ptr.vmem [resolvable:$true] %s62_s10  ;;  %s23_s13 = int_to_ptr.hbm [resolvable:$true] %s22_s13 }
   0x8   :  { %65 = dma.hbm_to_vmem [thread:$0]  %s61_s8, 32, %s63_s10, [#allocation9]  }
   0x9   :  { %s4679_s1 = smov [#allocation2]   ;;  %s46_s17 = sshll.u32 %s5010_s2, 4  ;;  %s47_s17 = int_to_ptr.hbm [resolvable:$true] %s46_s17 }
   0xa   :  { %s24_s14 = sshll.u32 %s4679_s1, 4  ;;  %s4680_s18 = smov 384   ;;  %s25_s14 = int_to_ptr.vmem [resolvable:$true] %s24_s14 }
   0xb   :  { %s4681_s3 = smov 24   ;;  %s4682_s19 = smov [#allocation7]  }
   0xc   :  { %30 = dma.hbm_to_vmem [thread:$0]  %s23_s13, 3072, %s25_s14, [#allocation3], %s4680_s18, %s4680_s18, %s4681_s3  }
   0xd   :  { %s48_s20 = sshll.u32 %s4682_s19, 4  ;;  %s4683_s21 = smov 128   ;;  %s49_s20 = int_to_ptr.vmem [resolvable:$true] %s48_s20 }
   0xe   :  { %s4684_s22 = smov 8   ;;  %s70_s24 = sshll.u32 %s5012_s4, 4  ;;  %s71_s24 = int_to_ptr.hbm [resolvable:$true] %s70_s24 }
   0xf   :  { %54 = dma.hbm_to_vmem [thread:$0]  %s47_s17, 12288, %s49_s20, [#allocation6], %s4683_s21, %s4683_s21, %s4684_s22  }
  0x10   :  { %s4685_s25 = smov [#allocation10]   ;;  %s4686_s27 = smov 256  }
  0x11   :  { %s72_s26 = sshll.u32 %s4685_s25, 4  ;;  %s4687_s2 = smov 16   ;;  %s73_s26 = int_to_ptr.vmem [resolvable:$true] %s72_s26 }
  0x12   :  { %78 = dma.hbm_to_vmem [thread:$0]  %s71_s24, 24576, %s73_s26, [#allocation9], %s4686_s27, %s4686_s27, %s4687_s2  }
  0x13   :  { %4667 = dma.done.wait [#allocation3], 3072  }
  0x14   :  { %4668 = vsyncadd [#allocation3], 4294964224 }
  0x15   :  { %4669 = dma.done.wait [#allocation6], 12672  }
  0x16   :  { %4670 = vsyncadd [#allocation6], 4294954624 }
  0x17   :  { %4671 = dma.done.wait [#allocation9], 24608  }
  0x18   :  { %4672 = vsyncadd [#allocation9], 4294942688  ;;  %v3080_v0 = vld [vmem:[#allocation7 + $0x70] sm:$0xf]  ;;  %v4213_v1 = vld [vmem:[#allocation7 + $0x74] sm:$0xf0] }
  0x19   :  { %v3144_v2 = vld [vmem:[#allocation7 + $0xf0] sm:$0xf]  ;;  %v3081_v3 = vor.u32 %v4213_v1, %v3080_v0  ;;  %v4229_v4 = vld [vmem:[#allocation7 + $0xf4] sm:$0xf0]  ;;  %v3072_v11 = vld [vmem:[#allocation7 + $0x60] sm:$0xf] }
  0x1a   :  { %v3208_v5 = vld [vmem:[#allocation7 + $0x170] sm:$0xf]  ;;  %v4245_v6 = vld [vmem:[#allocation7 + $0x174] sm:$0xf0]  ;;  %v3145_v7 = vor.u32 %v4229_v4, %v3144_v2  ;;  %v4211_v13 = vld [vmem:[#allocation7 + $0x64] sm:$0xf0] }
  0x1b   :  { %v3209_v8 = vor.u32 %v4245_v6, %v3208_v5  ;;  %v3272_v9 = vld [vmem:[#allocation7 + $0x1f0] sm:$0xf]  ;;  %v4261_v10 = vld [vmem:[#allocation7 + $0x1f4] sm:$0xf0]  ;;  %827 = vmatpush.bf16.msra.mxu0 %v3081_v3  ;;  %v3136_v14 = vld [vmem:[#allocation7 + $0xe0] sm:$0xf]  ;;  %v3073_v16 = vor.u32 %v4211_v13, %v3072_v11 }
  0x1c   :  { %v3273_v12 = vor.u32 %v4261_v10, %v3272_v9  ;;  %v4227_v15 = vld [vmem:[#allocation7 + $0xe4] sm:$0xf0]  ;;  %856 = vmatpush.bf16.msra.mxu1 %v3145_v7  ;;  %v3200_v18 = vld [vmem:[#allocation7 + $0x160] sm:$0xf]  ;;  %v3064_v23 = vld [vmem:[#allocation7 + $0x50] sm:$0xf] }
  0x1d   :  { %885 = vmatpush.bf16.msra.mxu2 %v3209_v8  ;;  %v3137_v17 = vor.u32 %v4227_v15, %v3136_v14  ;;  %v4243_v19 = vld [vmem:[#allocation7 + $0x164] sm:$0xf0]  ;;  %v3264_v20 = vld [vmem:[#allocation7 + $0x1e0] sm:$0xf]  ;;  %v4209_v24 = vld [vmem:[#allocation7 + $0x54] sm:$0xf0] }
  0x1e   :  { %914 = vmatpush.bf16.msra.mxu3 %v3273_v12  ;;  %v3201_v21 = vor.u32 %v4243_v19, %v3200_v18  ;;  %v4259_v22 = vld [vmem:[#allocation7 + $0x1e4] sm:$0xf0]  ;;  %v3128_v26 = vld [vmem:[#allocation7 + $0xd0] sm:$0xf]  ;;  %v4225_v27 = vld [vmem:[#allocation7 + $0xd4] sm:$0xf0]  ;;  %v3065_v29 = vor.u32 %v4209_v24, %v3064_v23 }
  0x1f   :  { %v3265_v25 = vor.u32 %v4259_v22, %v3264_v20  ;;  %v3192_v28 = vld [vmem:[#allocation7 + $0x150] sm:$0xf]  ;;  %828 = vmatpush.bf16.msra.mxu0 %v3073_v16  ;;  %v4241_v30 = vld [vmem:[#allocation7 + $0x154] sm:$0xf0]  ;;  %v3129_v33 = vor.u32 %v4225_v27, %v3128_v26  ;;  %v3056_v35 = vld [vmem:[#allocation7 + $0x40] sm:$0xf] }
  0x20   :  { %v3256_v31 = vld [vmem:[#allocation7 + $0x1d0] sm:$0xf]  ;;  %v4257_v32 = vld [vmem:[#allocation7 + $0x1d4] sm:$0xf0]  ;;  %857 = vmatpush.bf16.msra.mxu1 %v3137_v17  ;;  %v3193_v34 = vor.u32 %v4241_v30, %v3192_v28  ;;  %v4207_v36 = vld [vmem:[#allocation7 + $0x44] sm:$0xf0] }
  0x21   :  { %886 = vmatpush.bf16.msra.mxu2 %v3201_v21  ;;  %v3120_v37 = vld [vmem:[#allocation7 + $0xc0] sm:$0xf]  ;;  %v3257_v38 = vor.u32 %v4257_v32, %v3256_v31  ;;  %v4223_v39 = vld [vmem:[#allocation7 + $0xc4] sm:$0xf0]  ;;  %v3057_v44 = vor.u32 %v4207_v36, %v3056_v35  ;;  %v3048_v47 = vld [vmem:[#allocation7 + $0x30] sm:$0xf] }
  0x22   :  { %915 = vmatpush.bf16.msra.mxu3 %v3265_v25  ;;  %v3184_v40 = vld [vmem:[#allocation7 + $0x140] sm:$0xf]  ;;  %v4239_v41 = vld [vmem:[#allocation7 + $0x144] sm:$0xf0]  ;;  %v3121_v45 = vor.u32 %v4223_v39, %v3120_v37  ;;  %v4205_v48 = vld [vmem:[#allocation7 + $0x34] sm:$0xf0] }
  0x23   :  { %v3248_v42 = vld [vmem:[#allocation7 + $0x1c0] sm:$0xf]  ;;  %v4255_v43 = vld [vmem:[#allocation7 + $0x1c4] sm:$0xf0]  ;;  %829 = vmatpush.bf16.msra.mxu0 %v3065_v29  ;;  %v3185_v46 = vor.u32 %v4239_v41, %v3184_v40  ;;  %v3112_v49 = vld [vmem:[#allocation7 + $0xb0] sm:$0xf]  ;;  %v3049_v56 = vor.u32 %v4205_v48, %v3048_v47 }
  0x24   :  { %858 = vmatpush.bf16.msra.mxu1 %v3129_v33  ;;  %v3249_v50 = vor.u32 %v4255_v43, %v3248_v42  ;;  %v4221_v51 = vld [vmem:[#allocation7 + $0xb4] sm:$0xf0]  ;;  %v3176_v52 = vld [vmem:[#allocation7 + $0x130] sm:$0xf]  ;;  %v3040_v59 = vld [vmem:[#allocation7 + $0x20] sm:$0xf] }
  0x25   :  { %887 = vmatpush.bf16.msra.mxu2 %v3193_v34  ;;  %v4237_v53 = vld [vmem:[#allocation7 + $0x134] sm:$0xf0]  ;;  %v3240_v54 = vld [vmem:[#allocation7 + $0x1b0] sm:$0xf]  ;;  %v3113_v57 = vor.u32 %v4221_v51, %v3112_v49  ;;  %v4203_v60 = vld [vmem:[#allocation7 + $0x24] sm:$0xf0] }
  0x26   :  { %916 = vmatpush.bf16.msra.mxu3 %v3257_v38  ;;  %v4253_v55 = vld [vmem:[#allocation7 + $0x1b4] sm:$0xf0]  ;;  %v3177_v58 = vor.u32 %v4237_v53, %v3176_v52  ;;  %v3104_v61 = vld [vmem:[#allocation7 + $0xa0] sm:$0xf]  ;;  %v4219_v63 = vld [vmem:[#allocation7 + $0xa4] sm:$0xf0]  ;;  %v3041_v4 = vor.u32 %v4203_v60, %v3040_v59 }
  0x27   :  { %830 = vmatpush.bf16.msra.mxu0 %v3057_v44  ;;  %v3241_v62 = vor.u32 %v4253_v55, %v3240_v54  ;;  %v3168_v0 = vld [vmem:[#allocation7 + $0x120] sm:$0xf]  ;;  %v4235_v1 = vld [vmem:[#allocation7 + $0x124] sm:$0xf0]  ;;  %v3105_v5 = vor.u32 %v4219_v63, %v3104_v61  ;;  %v3032_v7 = vld [vmem:[#allocation7 + $0x10] sm:$0xf] }
  0x28   :  { %859 = vmatpush.bf16.msra.mxu1 %v3121_v45  ;;  %v3232_v2 = vld [vmem:[#allocation7 + $0x1a0] sm:$0xf]  ;;  %v4251_v3 = vld [vmem:[#allocation7 + $0x1a4] sm:$0xf0]  ;;  %v3169_v6 = vor.u32 %v4235_v1, %v3168_v0  ;;  %v4201_v8 = vld [vmem:[#allocation7 + $0x14] sm:$0xf0] }
  0x29   :  { %888 = vmatpush.bf16.msra.mxu2 %v3185_v46  ;;  %v3096_v9 = vld [vmem:[#allocation7 + $0x90] sm:$0xf]  ;;  %v3233_v10 = vor.u32 %v4251_v3, %v3232_v2  ;;  %v4217_v11 = vld [vmem:[#allocation7 + $0x94] sm:$0xf0]  ;;  %v3033_v16 = vor.u32 %v4201_v8, %v3032_v7  ;;  %v3024_v19 = vld [vmem:[#allocation7] sm:$0xf] }
  0x2a   :  { %917 = vmatpush.bf16.msra.mxu3 %v3249_v50  ;;  %v3160_v12 = vld [vmem:[#allocation7 + $0x110] sm:$0xf]  ;;  %v4233_v13 = vld [vmem:[#allocation7 + $0x114] sm:$0xf0]  ;;  %v3097_v17 = vor.u32 %v4217_v11, %v3096_v9  ;;  %v4199_v20 = vld [vmem:[#allocation7 + $0x4] sm:$0xf0] }
  0x2b   :  { %831 = vmatpush.bf16.msra.mxu0 %v3049_v56  ;;  %v3224_v14 = vld [vmem:[#allocation7 + $0x190] sm:$0xf]  ;;  %v4249_v15 = vld [vmem:[#allocation7 + $0x194] sm:$0xf0]  ;;  %v3161_v18 = vor.u32 %v4233_v13, %v3160_v12  ;;  %v3088_v21 = vld [vmem:[#allocation7 + $0x80] sm:$0xf]  ;;  %v3025_v28 = vor.u32 %v4199_v20, %v3024_v19 }
  0x2c   :  { %860 = vmatpush.bf16.msra.mxu1 %v3113_v57  ;;  %v3225_v22 = vor.u32 %v4249_v15, %v3224_v14  ;;  %v4215_v23 = vld [vmem:[#allocation7 + $0x84] sm:$0xf0]  ;;  %v3152_v24 = vld [vmem:[#allocation7 + $0x100] sm:$0xf]  ;;  %v4174_v31 = vld [vmem:[#allocation2 + $0x4] sm:$0xf] }
  0x2d   :  { %889 = vmatpush.bf16.msra.mxu2 %v3177_v58  ;;  %v4231_v25 = vld [vmem:[#allocation7 + $0x104] sm:$0xf0]  ;;  %v3216_v26 = vld [vmem:[#allocation7 + $0x180] sm:$0xf]  ;;  %v3089_v32 = vor.u32 %v4215_v23, %v3088_v21  ;;  %v2930_v34 = vld [vmem:[#allocation2 + $0x18] sm:$0xf0] }
  0x2e   :  { %918 = vmatpush.bf16.msra.mxu3 %v3241_v62  ;;  %v4247_v27 = vld [vmem:[#allocation7 + $0x184] sm:$0xf0]  ;;  %v4177_v30 = vld [vmem:[#allocation2 + $0x14] sm:$0xf0]  ;;  %v3153_v33 = vor.u32 %v4231_v25, %v3152_v24  ;;  %v2936_v35 = vld [vmem:[#allocation2 + $0x8] sm:$0xf]  ;;  %v4747_v41 = vor.u32 %v4174_v31, %v2930_v34 }
  0x2f   :  { %832 = vmatpush.bf16.msra.mxu0 %v3041_v4  ;;  %v2928_v29 = vld [vmem:[#allocation2] sm:$0xf]  ;;  %v3217_v37 = vor.u32 %v4247_v27, %v3216_v26  ;;  %v4175_v38 = vld [vmem:[#allocation2 + $0xc] sm:$0xf]  ;;  %v2938_v39 = vld [vmem:[#allocation2 + $0x20] sm:$0xf0] }
  0x30   :  { %861 = vmatpush.bf16.msra.mxu1 %v3105_v5  ;;  %v4178_v36 = vld [vmem:[#allocation2 + $0x1c] sm:$0xf0]  ;;  %v4745_v40 = vor.u32 %v4177_v30, %v2928_v29  ;;  %v4751_v43 = vor.u32 %v4175_v38, %v2938_v39  ;;  %v3336_v44 = vld [vmem:[#allocation7 + $0x270] sm:$0xf]  ;;  %v4277_v45 = vld [vmem:[#allocation7 + $0x274] sm:$0xf0] }
  0x31   :  { %890 = vmatpush.bf16.msra.mxu2 %v3169_v6  ;;  %v4749_v42 = vor.u32 %v4178_v36, %v2936_v35  ;;  %v3400_v46 = vld [vmem:[#allocation7 + $0x2f0] sm:$0xf]  ;;  %v3337_v47 = vor.u32 %v4277_v45, %v3336_v44  ;;  %v4293_v48 = vld [vmem:[#allocation7 + $0x2f4] sm:$0xf0]  ;;  %v4212_v49 = vld [vmem:[#allocation7 + $0x74] sm:$0xf] }
  0x32   :  { %919 = vmatpush.bf16.msra.mxu3 %v3233_v10  ;;  %v3082_v50 = vld [vmem:[#allocation7 + $0x78] sm:$0xf0]  ;;  %v3401_v51 = vor.u32 %v4293_v48, %v3400_v46  ;;  %v4228_v53 = vld [vmem:[#allocation7 + $0xf4] sm:$0xf]  ;;  %v3328_v55 = vld [vmem:[#allocation7 + $0x260] sm:$0xf] }
  0x33   :  { %833 = vmatpush.bf16.msra.mxu0 %v3033_v16  ;;  %v3085_v52 = vor.u32 %v4212_v49, %v3082_v50  ;;  %v3146_v54 = vld [vmem:[#allocation7 + $0xf8] sm:$0xf0]  ;;  %v4275_v57 = vld [vmem:[#allocation7 + $0x264] sm:$0xf0]  ;;  %v3392_v58 = vld [vmem:[#allocation7 + $0x2e0] sm:$0xf] }
  0x34   :  { %862 = vmatpush.bf16.msra.mxu1 %v3097_v17  ;;  %v3149_v56 = vor.u32 %v4228_v53, %v3146_v54  ;;  %v4291_v59 = vld [vmem:[#allocation7 + $0x2e4] sm:$0xf0]  ;;  %v3329_v60 = vor.u32 %v4275_v57, %v3328_v55  ;;  %v4210_v62 = vld [vmem:[#allocation7 + $0x64] sm:$0xf]  ;;  %v3074_v63 = vld [vmem:[#allocation7 + $0x68] sm:$0xf0] }
  0x35   :  { %891 = vmatpush.bf16.msra.mxu2 %v3161_v18  ;;  %v3393_v61 = vor.u32 %v4291_v59, %v3392_v58  ;;  %v4226_v0 = vld [vmem:[#allocation7 + $0xe4] sm:$0xf]  ;;  %v3077_v1 = vor.u32 %v4210_v62, %v3074_v63  ;;  %v3138_v2 = vld [vmem:[#allocation7 + $0xe8] sm:$0xf0]  ;;  %v3320_v3 = vld [vmem:[#allocation7 + $0x250] sm:$0xf] }
  0x36   :  { %920 = vmatpush.bf16.msra.mxu3 %v3225_v22  ;;  %v4273_v4 = vld [vmem:[#allocation7 + $0x254] sm:$0xf0]  ;;  %v4183_v6 = vld [vmem:[#allocation2 + $0x44] sm:$0xf0]  ;;  %v3141_v7 = vor.u32 %v4226_v0, %v3138_v2  ;;  %v4208_v10 = vld [vmem:[#allocation7 + $0x54] sm:$0xf] }
  0x37   :  { %834 = vmatpush.bf16.msra.mxu0 %v3025_v28  ;;  %v2952_v5 = vld [vmem:[#allocation2 + $0x30] sm:$0xf]  ;;  %v3384_v8 = vld [vmem:[#allocation7 + $0x2d0] sm:$0xf]  ;;  %v3321_v11 = vor.u32 %v4273_v4, %v3320_v3  ;;  %v3066_v12 = vld [vmem:[#allocation7 + $0x58] sm:$0xf0] }
  0x38   :  { %863 = vmatpush.bf16.msra.mxu1 %v3089_v32  ;;  %v4289_v9 = vld [vmem:[#allocation7 + $0x2d4] sm:$0xf0]  ;;  %v4224_v13 = vld [vmem:[#allocation7 + $0xd4] sm:$0xf]  ;;  %v3130_v14 = vld [vmem:[#allocation7 + $0xd8] sm:$0xf0]  ;;  %v3069_v19 = vor.u32 %v4208_v10, %v3066_v12  ;;  %v4757_v27 = vor.u32 %v4183_v6, %v2952_v5 }
  0x39   :  { %892 = vmatpush.bf16.msra.mxu2 %v3153_v33  ;;  %v4180_v15 = vld [vmem:[#allocation2 + $0x34] sm:$0xf]  ;;  %v2954_v16 = vld [vmem:[#allocation2 + $0x48] sm:$0xf0]  ;;  %v2960_v17 = vld [vmem:[#allocation2 + $0x38] sm:$0xf]  ;;  %v3385_v18 = vor.u32 %v4289_v9, %v3384_v8  ;;  %v3133_v23 = vor.u32 %v4224_v13, %v3130_v14 }
  0x3a   :  { %921 = vmatpush.bf16.msra.mxu3 %v3217_v37  ;;  %835 = vmatmul.bf16.vlgmr.msra.gmra.mxu0 %v4745_v40  ;;  %v4184_v20 = vld [vmem:[#allocation2 + $0x4c] sm:$0xf0]  ;;  %v4181_v21 = vld [vmem:[#allocation2 + $0x3c] sm:$0xf]  ;;  %v2962_v22 = vld [vmem:[#allocation2 + $0x50] sm:$0xf0]  ;;  %v4759_v31 = vor.u32 %v4180_v15, %v2954_v16 }
  0x3b   :  { %864 = vmatmul.bf16.vlgmr.msra.gmra.mxu1 %v4747_v41  ;;  %943 = vmatpush.bf16.msrb.mxu0 %v3337_v47  ;;  %v3312_v24 = vld [vmem:[#allocation7 + $0x240] sm:$0xf]  ;;  %v4271_v25 = vld [vmem:[#allocation7 + $0x244] sm:$0xf0]  ;;  %v4206_v29 = vld [vmem:[#allocation7 + $0x44] sm:$0xf]  ;;  %v4761_v32 = vor.u32 %v4184_v20, %v2960_v17  ;;  %v4763_v35 = vor.u32 %v4181_v21, %v2962_v22 }
  0x3c   :  { %893 = vmatmul.bf16.vlgmr.msra.gmra.mxu2 %v4749_v42  ;;  %972 = vmatpush.bf16.msrb.mxu1 %v3401_v51  ;;  %v3376_v26 = vld [vmem:[#allocation7 + $0x2c0] sm:$0xf]  ;;  %v4287_v28 = vld [vmem:[#allocation7 + $0x2c4] sm:$0xf0]  ;;  %v3058_v30 = vld [vmem:[#allocation7 + $0x48] sm:$0xf0]  ;;  %v3313_v36 = vor.u32 %v4271_v25, %v3312_v24 }
  0x3d   :  { %922 = vmatmul.bf16.vlgmr.msra.gmra.mxu3 %v4751_v43  ;;  %1001 = vmatpush.bf16.msrb.mxu2 %v3085_v52  ;;  %v4222_v33 = vld [vmem:[#allocation7 + $0xc4] sm:$0xf]  ;;  %v3122_v34 = vld [vmem:[#allocation7 + $0xc8] sm:$0xf0]  ;;  %v3377_v37 = vor.u32 %v4287_v28, %v3376_v26  ;;  %v3061_v38 = vor.u32 %v4206_v29, %v3058_v30  ;;  %v3304_v44 = vld [vmem:[#allocation7 + $0x230] sm:$0xf] }
  0x3e   :  { %1030 = vmatpush.bf16.msrb.mxu3 %v3149_v56  ;;  %v3125_v39 = vor.u32 %v4222_v33, %v3122_v34  ;;  %v4269_v45 = vld [vmem:[#allocation7 + $0x234] sm:$0xf0]  ;;  %v3368_v46 = vld [vmem:[#allocation7 + $0x2b0] sm:$0xf]  ;;  %v4204_v49 = vld [vmem:[#allocation7 + $0x34] sm:$0xf] }
  0x3f   :  { %944 = vmatpush.bf16.msrb.mxu0 %v3329_v60  ;;  %v3305_v47 = vor.u32 %v4269_v45, %v3304_v44  ;;  %v4285_v48 = vld [vmem:[#allocation7 + $0x2b4] sm:$0xf0]  ;;  %v3050_v50 = vld [vmem:[#allocation7 + $0x38] sm:$0xf0]  ;;  %v4220_v53 = vld [vmem:[#allocation7 + $0xb4] sm:$0xf] }
  0x40   :  { %973 = vmatpush.bf16.msrb.mxu1 %v3393_v61  ;;  %v3369_v51 = vor.u32 %v4285_v48, %v3368_v46  ;;  %v3053_v52 = vor.u32 %v4204_v49, %v3050_v50  ;;  %v3114_v54 = vld [vmem:[#allocation7 + $0xb8] sm:$0xf0]  ;;  %v3296_v55 = vld [vmem:[#allocation7 + $0x220] sm:$0xf]  ;;  %v4267_v57 = vld [vmem:[#allocation7 + $0x224] sm:$0xf0] }
  0x41   :  { %1002 = vmatpush.bf16.msrb.mxu2 %v3077_v1  ;;  %v3117_v56 = vor.u32 %v4220_v53, %v3114_v54  ;;  %v3360_v58 = vld [vmem:[#allocation7 + $0x2a0] sm:$0xf]  ;;  %v4283_v59 = vld [vmem:[#allocation7 + $0x2a4] sm:$0xf0]  ;;  %v4202_v60 = vld [vmem:[#allocation7 + $0x24] sm:$0xf]  ;;  %v3297_v63 = vor.u32 %v4267_v57, %v3296_v55 }
  0x42   :  { %1031 = vmatpush.bf16.msrb.mxu3 %v3141_v7  ;;  %v3042_v61 = vld [vmem:[#allocation7 + $0x28] sm:$0xf0]  ;;  %v4218_v62 = vld [vmem:[#allocation7 + $0xa4] sm:$0xf]  ;;  %v2976_v1 = vld [vmem:[#allocation2 + $0x60] sm:$0xf]  ;;  %v3361_v3 = vor.u32 %v4283_v59, %v3360_v58 }
  0x43   :  { %945 = vmatpush.bf16.msrb.mxu0 %v3321_v11  ;;  %v3106_v0 = vld [vmem:[#allocation7 + $0xa8] sm:$0xf0]  ;;  %v4189_v2 = vld [vmem:[#allocation2 + $0x74] sm:$0xf0]  ;;  %v3045_v4 = vor.u32 %v4202_v60, %v3042_v61  ;;  %v3288_v5 = vld [vmem:[#allocation7 + $0x210] sm:$0xf] }
  0x44   :  { %974 = vmatpush.bf16.msrb.mxu1 %v3385_v18  ;;  %v4265_v6 = vld [vmem:[#allocation7 + $0x214] sm:$0xf0]  ;;  %v3352_v7 = vld [vmem:[#allocation7 + $0x290] sm:$0xf]  ;;  %v4186_v8 = vld [vmem:[#allocation2 + $0x64] sm:$0xf]  ;;  %v3109_v10 = vor.u32 %v4218_v62, %v3106_v0  ;;  %v4769_v26 = vor.u32 %v4189_v2, %v2976_v1 }
  0x45   :  { %1003 = vmatpush.bf16.msrb.mxu2 %v3069_v19  ;;  %v2978_v9 = vld [vmem:[#allocation2 + $0x78] sm:$0xf0]  ;;  %v4281_v11 = vld [vmem:[#allocation7 + $0x294] sm:$0xf0]  ;;  %v4200_v12 = vld [vmem:[#allocation7 + $0x14] sm:$0xf]  ;;  %v3289_v20 = vor.u32 %v4265_v6, %v3288_v5 }
  0x46   :  { %1032 = vmatpush.bf16.msrb.mxu3 %v3133_v23  ;;  %v3034_v13 = vld [vmem:[#allocation7 + $0x18] sm:$0xf0]  ;;  %v2984_v14 = vld [vmem:[#allocation2 + $0x68] sm:$0xf]  ;;  %v4216_v15 = vld [vmem:[#allocation7 + $0x94] sm:$0xf]  ;;  %v3353_v21 = vor.u32 %v4281_v11, %v3352_v7  ;;  %v4771_v34 = vor.u32 %v4186_v8, %v2978_v9 }
  0x47   :  { %946 = vmatpush.bf16.msrb.mxu0 %v3313_v36  ;;  %v3098_v16 = vld [vmem:[#allocation7 + $0x98] sm:$0xf0]  ;;  %v4190_v17 = vld [vmem:[#allocation2 + $0x7c] sm:$0xf0]  ;;  %v4187_v18 = vld [vmem:[#allocation2 + $0x6c] sm:$0xf]  ;;  %v3037_v22 = vor.u32 %v4200_v12, %v3034_v13 }
  0x48   :  { %975 = vmatpush.bf16.msrb.mxu1 %v3377_v37  ;;  %v2986_v19 = vld [vmem:[#allocation2 + $0x80] sm:$0xf0]  ;;  %v3280_v23 = vld [vmem:[#allocation7 + $0x200] sm:$0xf]  ;;  %v4263_v24 = vld [vmem:[#allocation7 + $0x204] sm:$0xf0]  ;;  %v3101_v28 = vor.u32 %v4216_v15, %v3098_v16  ;;  %v4773_v36 = vor.u32 %v4190_v17, %v2984_v14 }
  0x49   :  { %1004 = vmatpush.bf16.msrb.mxu2 %v3061_v38  ;;  %v3344_v25 = vld [vmem:[#allocation7 + $0x280] sm:$0xf]  ;;  %v4279_v29 = vld [vmem:[#allocation7 + $0x284] sm:$0xf0]  ;;  %v4198_v30 = vld [vmem:[#allocation7 + $0x4] sm:$0xf]  ;;  %v3281_v44 = vor.u32 %v4263_v24, %v3280_v23 }
  0x4a   :  { %840 = vmatmul.bf16.gmra.mxu0 %v4757_v27  ;;  %1033 = vmatpush.bf16.msrb.mxu3 %v3125_v39  ;;  %v3026_v33 = vld [vmem:[#allocation7 + $0x8] sm:$0xf0]  ;;  %v4214_v37 = vld [vmem:[#allocation7 + $0x84] sm:$0xf]  ;;  %v4775_v39 = vor.u32 %v4187_v18, %v2986_v19  ;;  %v3345_v45 = vor.u32 %v4279_v29, %v3344_v25  ;;  %v3000_v48 = vld [vmem:[#allocation2 + $0x90] sm:$0xf] }
  0x4b   :  { %869 = vmatmul.bf16.gmra.mxu1 %v4759_v31  ;;  %947 = vmatpush.bf16.msrb.mxu0 %v3305_v47  ;;  %v3090_v38 = vld [vmem:[#allocation7 + $0x88] sm:$0xf0]  ;;  %v3029_v46 = vor.u32 %v4198_v30, %v3026_v33  ;;  %v4195_v49 = vld [vmem:[#allocation2 + $0xa4] sm:$0xf0]  ;;  %v4192_v50 = vld [vmem:[#allocation2 + $0x94] sm:$0xf] }
  0x4c   :  { %898 = vmatmul.bf16.gmra.mxu2 %v4761_v32  ;;  %976 = vmatpush.bf16.msrb.mxu1 %v3369_v51  ;;  %v3093_v47 = vor.u32 %v4214_v37, %v3090_v38  ;;  %v3002_v51 = vld [vmem:[#allocation2 + $0xa8] sm:$0xf0]  ;;  %v4196_v53 = vld [vmem:[#allocation2 + $0xac] sm:$0xf0]  ;;  %v4193_v54 = vld [vmem:[#allocation2 + $0x9c] sm:$0xf] }
  0x4d   :  { %927 = vmatmul.bf16.gmra.mxu3 %v4763_v35  ;;  %1005 = vmatpush.bf16.msrb.mxu2 %v3053_v52  ;;  %v3008_v52 = vld [vmem:[#allocation2 + $0x98] sm:$0xf]  ;;  %v3010_v55 = vld [vmem:[#allocation2 + $0xb0] sm:$0xf0]  ;;  %v4783_v57 = vor.u32 %v4192_v50, %v3002_v51  ;;  %v2944_v60 = vld [vmem:[#allocation2 + $0x10] sm:$0xf] }
  0x4e   :  { %1034 = vmatpush.bf16.msrb.mxu3 %v3117_v56  ;;  %v4781_v56 = vor.u32 %v4195_v49, %v3000_v48  ;;  %v4785_v58 = vor.u32 %v4196_v53, %v3008_v52  ;;  %v4787_v59 = vor.u32 %v4193_v54, %v3010_v55  ;;  %v4179_v61 = vld [vmem:[#allocation2 + $0x24] sm:$0xf0]  ;;  %v4176_v62 = vld [vmem:[#allocation2 + $0x14] sm:$0xf]  ;;  %v4244_v2 = vld [vmem:[#allocation7 + $0x174] sm:$0xf] }
  0x4f   :  { %948 = vmatpush.bf16.msrb.mxu0 %v3297_v63  ;;  %v2946_v63 = vld [vmem:[#allocation2 + $0x28] sm:$0xf0]  ;;  %v4793_v0 = vor.u32 %v4179_v61, %v2944_v60  ;;  %v3274_v6 = vld [vmem:[#allocation7 + $0x1f8] sm:$0xf0]  ;;  %v4242_v13 = vld [vmem:[#allocation7 + $0x164] sm:$0xf] }
  0x50   :  { %977 = vmatpush.bf16.msrb.mxu1 %v3361_v3  ;;  %v4795_v1 = vor.u32 %v4176_v62, %v2946_v63  ;;  %v3210_v3 = vld [vmem:[#allocation7 + $0x178] sm:$0xf0]  ;;  %v4276_v7 = vld [vmem:[#allocation7 + $0x274] sm:$0xf]  ;;  %v3202_v15 = vld [vmem:[#allocation7 + $0x168] sm:$0xf0] }
  0x51   :  { %1006 = vmatpush.bf16.msrb.mxu2 %v3045_v4  ;;  %v4260_v4 = vld [vmem:[#allocation7 + $0x1f4] sm:$0xf]  ;;  %v3213_v5 = vor.u32 %v4244_v2, %v3210_v3  ;;  %v3338_v8 = vld [vmem:[#allocation7 + $0x278] sm:$0xf0]  ;;  %v4258_v16 = vld [vmem:[#allocation7 + $0x1e4] sm:$0xf]  ;;  %v3205_v18 = vor.u32 %v4242_v13, %v3202_v15 }
  0x52   :  { %1035 = vmatpush.bf16.msrb.mxu3 %v3109_v10  ;;  %v3277_v9 = vor.u32 %v4260_v4, %v3274_v6  ;;  %v3341_v10 = vor.u32 %v4276_v7, %v3338_v8  ;;  %v4292_v11 = vld [vmem:[#allocation7 + $0x2f4] sm:$0xf]  ;;  %v3402_v12 = vld [vmem:[#allocation7 + $0x2f8] sm:$0xf0]  ;;  %v3266_v17 = vld [vmem:[#allocation7 + $0x1e8] sm:$0xf0] }
  0x53   :  { %949 = vmatpush.bf16.msrb.mxu0 %v3289_v20  ;;  %v3405_v14 = vor.u32 %v4292_v11, %v3402_v12  ;;  %v4274_v19 = vld [vmem:[#allocation7 + $0x264] sm:$0xf]  ;;  %v3330_v20 = vld [vmem:[#allocation7 + $0x268] sm:$0xf0]  ;;  %v4240_v23 = vld [vmem:[#allocation7 + $0x154] sm:$0xf] }
  0x54   :  { %978 = vmatpush.bf16.msrb.mxu1 %v3353_v21  ;;  %v4290_v21 = vld [vmem:[#allocation7 + $0x2e4] sm:$0xf]  ;;  %v3194_v24 = vld [vmem:[#allocation7 + $0x158] sm:$0xf0]  ;;  %v4272_v30 = vld [vmem:[#allocation7 + $0x254] sm:$0xf] }
  0x55   :  { %1007 = vmatpush.bf16.msrb.mxu2 %v3037_v22  ;;  %v3333_v22 = vor.u32 %v4274_v19, %v3330_v20  ;;  %v3258_v29 = vld [vmem:[#allocation7 + $0x1d8] sm:$0xf0]  ;;  %v3197_v33 = vor.u32 %v4240_v23, %v3194_v24  ;;  %v4288_v38 = vld [vmem:[#allocation7 + $0x2d4] sm:$0xf]  ;;  %v4238_v48 = vld [vmem:[#allocation7 + $0x144] sm:$0xf] }
  0x56   :  { %1036 = vmatpush.bf16.msrb.mxu3 %v3101_v28  ;;  %v4256_v28 = vld [vmem:[#allocation7 + $0x1d4] sm:$0xf]  ;;  %v3322_v37 = vld [vmem:[#allocation7 + $0x258] sm:$0xf0]  ;;  %v3186_v49 = vld [vmem:[#allocation7 + $0x148] sm:$0xf0] }
  0x57   :  { %950 = vmatpush.bf16.msrb.mxu0 %v3281_v44  ;;  %v3386_v44 = vld [vmem:[#allocation7 + $0x2d8] sm:$0xf0]  ;;  %v4185_v50 = vld [vmem:[#allocation2 + $0x54] sm:$0xf0]  ;;  %v4254_v52 = vld [vmem:[#allocation7 + $0x1c4] sm:$0xf]  ;;  %v3189_v60 = vor.u32 %v4238_v48, %v3186_v49 }
  0x58   :  { %979 = vmatpush.bf16.msrb.mxu1 %v3345_v45  ;;  %v2968_v45 = vld [vmem:[#allocation2 + $0x40] sm:$0xf]  ;;  %v3389_v51 = vor.u32 %v4288_v38, %v3386_v44  ;;  %v3250_v53 = vld [vmem:[#allocation7 + $0x1c8] sm:$0xf0]  ;;  %v2970_v55 = vld [vmem:[#allocation2 + $0x58] sm:$0xf0] }
  0x59   :  { %1008 = vmatpush.bf16.msrb.mxu2 %v3029_v46  ;;  %v3261_v46 = vor.u32 %v4256_v28, %v3258_v29  ;;  %v4182_v54 = vld [vmem:[#allocation2 + $0x44] sm:$0xf]  ;;  %v4270_v61 = vld [vmem:[#allocation7 + $0x244] sm:$0xf]  ;;  %v4801_v63 = vor.u32 %v4185_v50, %v2968_v45  ;;  %v3253_v2 = vor.u32 %v4254_v52, %v3250_v53  ;;  %v4236_v8 = vld [vmem:[#allocation7 + $0x134] sm:$0xf] }
  0x5a   :  { %845 = vmatmul.bf16.gmra.mxu0 %v4769_v26  ;;  %1037 = vmatpush.bf16.msrb.mxu3 %v3093_v47  ;;  %v3325_v47 = vor.u32 %v4272_v30, %v3322_v37  ;;  %v3314_v62 = vld [vmem:[#allocation7 + $0x248] sm:$0xf0]  ;;  %v4286_v3 = vld [vmem:[#allocation7 + $0x2c4] sm:$0xf]  ;;  %v3242_v12 = vld [vmem:[#allocation7 + $0x1b8] sm:$0xf0] }
  0x5b   :  { %874 = vmatmul.bf16.gmra.mxu1 %v4771_v34  ;;  %1059 = vmatpush.bf16.msra.mxu0 %v3213_v5  ;;  %v3378_v4 = vld [vmem:[#allocation7 + $0x2c8] sm:$0xf0]  ;;  %v4803_v5 = vor.u32 %v4182_v54, %v2970_v55  ;;  %v3317_v6 = vor.u32 %v4270_v61, %v3314_v62  ;;  %v4268_v13 = vld [vmem:[#allocation7 + $0x234] sm:$0xf]  ;;  %v4266_v23 = vld [vmem:[#allocation7 + $0x224] sm:$0xf] }
  0x5c   :  { %903 = vmatmul.bf16.gmra.mxu2 %v4773_v36  ;;  %1088 = vmatpush.bf16.msra.mxu1 %v3277_v9  ;;  %v3381_v7 = vor.u32 %v4286_v3, %v3378_v4  ;;  %v3178_v9 = vld [vmem:[#allocation7 + $0x138] sm:$0xf0]  ;;  %v3170_v20 = vld [vmem:[#allocation7 + $0x128] sm:$0xf0]  ;;  %v4264_v45 = vld [vmem:[#allocation7 + $0x214] sm:$0xf] }
  0x5d   :  { %932 = vmatmul.bf16.gmra.mxu3 %v4775_v39  ;;  %1117 = vmatpush.bf16.msra.mxu2 %v3341_v10  ;;  %v4252_v10 = vld [vmem:[#allocation7 + $0x1b4] sm:$0xf]  ;;  %v3181_v11 = vor.u32 %v4236_v8, %v3178_v9  ;;  %v3298_v24 = vld [vmem:[#allocation7 + $0x228] sm:$0xf0]  ;;  %v3162_v29 = vld [vmem:[#allocation7 + $0x118] sm:$0xf0] }
  0x5e   :  { %1146 = vmatpush.bf16.msra.mxu3 %v3405_v14  ;;  %v3306_v14 = vld [vmem:[#allocation7 + $0x238] sm:$0xf0]  ;;  %v3245_v15 = vor.u32 %v4252_v10, %v3242_v12  ;;  %v3362_v28 = vld [vmem:[#allocation7 + $0x2a8] sm:$0xf0]  ;;  %v3301_v30 = vor.u32 %v4266_v23, %v3298_v24  ;;  %v4280_v48 = vld [vmem:[#allocation7 + $0x294] sm:$0xf] }
  0x5f   :  { %1060 = vmatpush.bf16.msra.mxu0 %v3205_v18  ;;  %v3370_v18 = vld [vmem:[#allocation7 + $0x2b8] sm:$0xf0]  ;;  %v2992_v50 = vld [vmem:[#allocation2 + $0x70] sm:$0xf]  ;;  %v2994_v53 = vld [vmem:[#allocation2 + $0x88] sm:$0xf0] }
  0x60   :  { %v3226_v37 = vld [vmem:[#allocation7 + $0x198] sm:$0xf0]  ;;  %v4230_v61 = vld [vmem:[#allocation7 + $0x104] sm:$0xf]  ;;  %v3154_v62 = vld [vmem:[#allocation7 + $0x108] sm:$0xf0] }
  0x61   :  { %1118 = vmatpush.bf16.msra.mxu2 %v3333_v22  ;;  %v3234_v22 = vld [vmem:[#allocation7 + $0x1a8] sm:$0xf0]  ;;  %v3354_v49 = vld [vmem:[#allocation7 + $0x298] sm:$0xf0]  ;;  %v3157_v4 = vor.u32 %v4230_v61, %v3154_v62  ;;  %v4420_v23 = vld [vmem:[#allocation10 + $0x3ec] sm:$0xf0] }
  0x62   :  { %v4188_v52 = vld [vmem:[#allocation2 + $0x74] sm:$0xf]  ;;  %v3357_v55 = vor.u32 %v4280_v48, %v3354_v49  ;;  %v3282_v8 = vld [vmem:[#allocation7 + $0x208] sm:$0xf0]  ;;  %v4380_v61 = vld [vmem:[#allocation10 + $0x2ac] sm:$0xf0] }
  0x63   :  { %1061 = vmatpush.bf16.msra.mxu0 %v3197_v33  ;;  %v4248_v33 = vld [vmem:[#allocation7 + $0x194] sm:$0xf]  ;;  %v4811_v3 = vor.u32 %v4188_v52, %v2994_v53  ;;  %v3346_v12 = vld [vmem:[#allocation7 + $0x288] sm:$0xf0]  ;;  %v3616_v52 = vld [vmem:[#allocation10 + $0x1a0] sm:$0xf] }
  0x64   :  { %v4194_v24 = vld [vmem:[#allocation2 + $0xa4] sm:$0xf]  ;;  %vm1315_vm0 = vcmask 1041409   ;;  %vm1317_vm1 = vcmask 1042434   ;;  %vm1319_vm2 = vcmask 1043459   ;;  %vm1321_vm3 = vcmask 1044484  }
  0x65   :  { %1119 = vmatpush.bf16.msra.mxu2 %v3325_v47  ;;  %v3229_v47 = vor.u32 %v4248_v33, %v3226_v37  ;;  %v4384_v33 = vld [vmem:[#allocation10 + $0x2cc] sm:$0xf0]  ;;  %v3018_v37 = vld [vmem:[#allocation2 + $0xb8] sm:$0xf0]  ;;  %vm1323_vm4 = vcmask 1045509   ;;  %vm1325_vm5 = vcmask 1046534  }
  0x66   :  { %v4819_v49 = vor.u32 %v4194_v24, %v3018_v37  ;;  %v4368_v37 = vld [vmem:[#allocation10 + $0x24c] sm:$0xf0]  ;;  %vm1327_vm6 = vcmask 1047559   ;;  %s2898_s9 = sshll.u32 %s5014_s6, 4  ;;  %s4689_s6 = smov [#allocation12]   ;;  %s2899_s9 = int_to_ptr.hbm [resolvable:$true] %s2898_s9 }
  0x67   :  { %1062 = vmatpush.bf16.msra.mxu0 %v3189_v60  ;;  %s2907_s10 = sshll.u32 %s4689_s6, 4  ;;  %s2909_s13 = sshll.u32 %s5015_s7, 4  ;;  %s2908_s10 = int_to_ptr.vmem [resolvable:$true] %s2907_s10  ;;  %s2910_s13 = int_to_ptr.hbm [resolvable:$true] %s2909_s13 }
  0x69   :  { %1120 = vmatpush.bf16.msra.mxu2 %v3317_v6  ;;  %v3218_v6 = vld [vmem:[#allocation7 + $0x188] sm:$0xf0] }
  0x6a   :  { %850 = vmatmul.bf16.gmra.mxu0 %v4781_v56 }
  0x6b   :  { %879 = vmatmul.bf16.gmra.mxu1 %v4783_v57  ;;  %1063 = vmatpush.bf16.msra.mxu0 %v3181_v11  ;;  %v4278_v11 = vld [vmem:[#allocation7 + $0x284] sm:$0xf] }
  0x6c   :  { %908 = vmatmul.bf16.gmra.mxu2 %v4785_v58 }
  0x6d   :  { %937 = vmatmul.bf16.gmra.mxu3 %v4787_v59 }
  0x7a   :  { %951 = vmatmul.bf16.vlgmr.msrb.gmra.mxu0 %v4793_v0 }
  0x7b   :  { %980 = vmatmul.bf16.vlgmr.msrb.gmra.mxu1 %v4795_v1 }
  0x7c   :  { %1009 = vmatmul.bf16.vlgmr.msrb.gmra.mxu2 %v4745_v40  ;;  %v3269_v40 = vor.u32 %v4258_v16, %v3266_v17  ;;  %v3309_v16 = vor.u32 %v4268_v13, %v3306_v14  ;;  %v4284_v17 = vld [vmem:[#allocation7 + $0x2b4] sm:$0xf]  ;;  %v3349_v13 = vor.u32 %v4278_v11, %v3346_v12  ;;  %v3520_v14 = vld [vmem:[#allocation10 + $0xe0] sm:$0xf] }
  0x7d   :  { %1038 = vmatmul.bf16.vlgmr.msrb.gmra.mxu3 %v4747_v41  ;;  %v3394_v41 = vld [vmem:[#allocation7 + $0x2e8] sm:$0xf0]  ;;  %v3373_v19 = vor.u32 %v4284_v17, %v3370_v18  ;;  %v4356_v18 = vld [vmem:[#allocation10 + $0x1ec] sm:$0xf0] }
  0x7e   :  { %v3397_v25 = vor.u32 %v4290_v21, %v3394_v41  ;;  %1089 = vmatpush.bf16.msra.mxu1 %v3269_v40  ;;  %v4234_v40 = vld [vmem:[#allocation7 + $0x124] sm:$0xf]  ;;  %1121 = vmatpush.bf16.msra.mxu2 %v3309_v16  ;;  %v4344_v12 = vld [vmem:[#allocation10 + $0x18c] sm:$0xf0] }
  0x7f   :  { %v4250_v21 = vld [vmem:[#allocation7 + $0x1a4] sm:$0xf] }
  0x80   :  { %1147 = vmatpush.bf16.msra.mxu3 %v3397_v25  ;;  %v3237_v41 = vor.u32 %v4250_v21, %v3234_v22  ;;  %v4282_v25 = vld [vmem:[#allocation7 + $0x2a4] sm:$0xf]  ;;  %v4197_v21 = vld [vmem:[#allocation2 + $0xb4] sm:$0xf0] }
  0x81   :  { %v3365_v38 = vor.u32 %v4282_v25, %v3362_v28  ;;  %v3648_v16 = vld [vmem:[#allocation10 + $0x1e0] sm:$0xf] }
  0x82   :  { %1090 = vmatpush.bf16.msra.mxu1 %v3261_v46  ;;  %v3290_v46 = vld [vmem:[#allocation7 + $0x218] sm:$0xf0]  ;;  %1122 = vmatpush.bf16.msra.mxu2 %v3301_v30  ;;  %v3649_v22 = vor.u32 %v4356_v18, %v3648_v16  ;;  %v3504_v25 = vld [vmem:[#allocation10 + $0xc0] sm:$0xf]  ;;  %v4408_v18 = vld [vmem:[#allocation10 + $0x38c] sm:$0xf0] }
  0x83   :  { %v3293_v54 = vor.u32 %v4264_v45, %v3290_v46  ;;  %v3632_v28 = vld [vmem:[#allocation10 + $0x1c0] sm:$0xf]  ;;  %v4416_v46 = vld [vmem:[#allocation10 + $0x3cc] sm:$0xf0] }
  0x84   :  { %1148 = vmatpush.bf16.msra.mxu3 %v3389_v51  ;;  %v4191_v51 = vld [vmem:[#allocation2 + $0x84] sm:$0xf0]  ;;  %v3760_v30 = vld [vmem:[#allocation10 + $0x2c0] sm:$0xf] }
  0x85   :  { %v4809_v60 = vor.u32 %v4191_v51, %v2992_v50  ;;  %v3888_v45 = vld [vmem:[#allocation10 + $0x3c0] sm:$0xf]  ;;  %v4316_v51 = vld [vmem:[#allocation10 + $0xac] sm:$0xf0] }
  0x86   :  { %1091 = vmatpush.bf16.msra.mxu1 %v3253_v2  ;;  %v4246_v2 = vld [vmem:[#allocation7 + $0x184] sm:$0xf]  ;;  %1123 = vmatpush.bf16.msra.mxu2 %v3293_v54  ;;  %v4348_v54 = vld [vmem:[#allocation10 + $0x1ac] sm:$0xf0] }
  0x87   :  { %v3221_v9 = vor.u32 %v4246_v2, %v3218_v6  ;;  %v3488_v50 = vld [vmem:[#allocation10 + $0xa0] sm:$0xf]  ;;  %v3617_v62 = vor.u32 %v4348_v54, %v3616_v52  ;;  %v4412_v6 = vld [vmem:[#allocation10 + $0x3ac] sm:$0xf0] }
  0x88   :  { %1149 = vmatpush.bf16.msra.mxu3 %v3381_v7  ;;  %v4262_v7 = vld [vmem:[#allocation7 + $0x204] sm:$0xf]  ;;  %v3489_v53 = vor.u32 %v4316_v51, %v3488_v50  ;;  %v4300_v54 = vld [vmem:[#allocation10 + $0x2c] sm:$0xf0] }
  0x89   :  { %v3285_v10 = vor.u32 %v4262_v7, %v3282_v8  ;;  %v3472_v8 = vld [vmem:[#allocation10 + $0x80] sm:$0xf] }
  0x8a   :  { %956 = vmatmul.bf16.gmra.mxu0 %v4801_v63  ;;  %1092 = vmatpush.bf16.msra.mxu1 %v3245_v15  ;;  %v4324_v15 = vld [vmem:[#allocation10 + $0xec] sm:$0xf0] }
  0x8b   :  { %985 = vmatmul.bf16.gmra.mxu1 %v4803_v5  ;;  %1124 = vmatpush.bf16.msra.mxu2 %v3285_v10  ;;  %v3521_v17 = vor.u32 %v4324_v15, %v3520_v14  ;;  %v3600_v10 = vld [vmem:[#allocation10 + $0x180] sm:$0xf]  ;;  %v4376_v14 = vld [vmem:[#allocation10 + $0x28c] sm:$0xf0] }
  0x8c   :  { %1014 = vmatmul.bf16.gmra.mxu2 %v4757_v27  ;;  %v3173_v27 = vor.u32 %v4234_v40, %v3170_v20  ;;  %1150 = vmatpush.bf16.msra.mxu3 %v3373_v19  ;;  %v3776_v40 = vld [vmem:[#allocation10 + $0x2e0] sm:$0xf]  ;;  %v4388_v19 = vld [vmem:[#allocation10 + $0x2ec] sm:$0xf0]  ;;  %v3016_v20 = vld [vmem:[#allocation2 + $0xa0] sm:$0xf]  ;;  %v3601_v15 = vor.u32 %v4344_v12, %v3600_v10 }
  0x8d   :  { %1043 = vmatmul.bf16.gmra.mxu3 %v4759_v31  ;;  %v4232_v31 = vld [vmem:[#allocation7 + $0x114] sm:$0xf]  ;;  %v4817_v48 = vor.u32 %v4197_v21, %v3016_v20  ;;  %v3584_v20 = vld [vmem:[#allocation10 + $0x160] sm:$0xf] }
  0x8e   :  { %1064 = vmatpush.bf16.msra.mxu0 %v3173_v27  ;;  %v3165_v44 = vor.u32 %v4232_v31, %v3162_v29  ;;  %1093 = vmatpush.bf16.msra.mxu1 %v3237_v41  ;;  %v3777_v27 = vor.u32 %v4388_v19, %v3776_v40  ;;  %v3904_v41 = vld [vmem:[#allocation10 + $0x3e0] sm:$0xf]  ;;  %v4352_v29 = vld [vmem:[#allocation10 + $0x1cc] sm:$0xf0] }
  0x8f   :  { %v3456_v19 = vld [vmem:[#allocation10 + $0x60] sm:$0xf] }
  0x90   :  { %1151 = vmatpush.bf16.msra.mxu3 %v3365_v38  ;;  %2552 = vmatpush.bf16.msrb.mxu2 %v3777_v27  ;;  %v3633_v38 = vor.u32 %v4352_v29, %v3632_v28  ;;  %v4372_v27 = vld [vmem:[#allocation10 + $0x26c] sm:$0xf0]  ;;  %v3440_v28 = vld [vmem:[#allocation10 + $0x40] sm:$0xf] }
  0x91   :  { %v3568_v29 = vld [vmem:[#allocation10 + $0x140] sm:$0xf] }
  0x92   :  { %1065 = vmatpush.bf16.msra.mxu0 %v3165_v44  ;;  %1094 = vmatpush.bf16.msra.mxu1 %v3229_v47  ;;  %v3761_v44 = vor.u32 %v4384_v33, %v3760_v30  ;;  %v3889_v47 = vor.u32 %v4416_v46, %v3888_v45  ;;  %v4336_v30 = vld [vmem:[#allocation10 + $0x14c] sm:$0xf0]  ;;  %v3696_v33 = vld [vmem:[#allocation10 + $0x240] sm:$0xf] }
  0x93   :  { %v3824_v45 = vld [vmem:[#allocation10 + $0x340] sm:$0xf]  ;;  %v4400_v46 = vld [vmem:[#allocation10 + $0x34c] sm:$0xf0]  ;;  %v3697_v50 = vor.u32 %v4368_v37, %v3696_v33 }
  0x94   :  { %1152 = vmatpush.bf16.msra.mxu3 %v3357_v55  ;;  %2553 = vmatpush.bf16.msrb.mxu2 %v3761_v44  ;;  %v3744_v55 = vld [vmem:[#allocation10 + $0x2a0] sm:$0xf]  ;;  %v3825_v51 = vor.u32 %v4400_v46, %v3824_v45  ;;  %v4448_v46 = vld [vmem:[#allocation10 + $0x4cc] sm:$0xf0] }
  0x95   :  { %v3745_v2 = vor.u32 %v4380_v61, %v3744_v55  ;;  %v3552_v55 = vld [vmem:[#allocation10 + $0x120] sm:$0xf] }
  0x96   :  { %1066 = vmatpush.bf16.msra.mxu0 %v3157_v4  ;;  %1095 = vmatpush.bf16.msra.mxu1 %v3221_v9  ;;  %v3872_v4 = vld [vmem:[#allocation10 + $0x3a0] sm:$0xf]  ;;  %v4312_v9 = vld [vmem:[#allocation10 + $0x8c] sm:$0xf0] }
  0x97   :  { %v3873_v7 = vor.u32 %v4412_v6, %v3872_v4  ;;  %v3473_v11 = vor.u32 %v4312_v9, %v3472_v8  ;;  %v4332_v4 = vld [vmem:[#allocation10 + $0x12c] sm:$0xf0]  ;;  %v3680_v6 = vld [vmem:[#allocation10 + $0x220] sm:$0xf] }
  0x98   :  { %1153 = vmatpush.bf16.msra.mxu3 %v3349_v13  ;;  %v3728_v13 = vld [vmem:[#allocation10 + $0x280] sm:$0xf]  ;;  %2554 = vmatpush.bf16.msrb.mxu2 %v3745_v2  ;;  %v3553_v8 = vor.u32 %v4332_v4, %v3552_v55 }
  0x99   :  { %v3729_v16 = vor.u32 %v4376_v14, %v3728_v13  ;;  %v3808_v10 = vld [vmem:[#allocation10 + $0x320] sm:$0xf] }
  0x9a   :  { %961 = vmatmul.bf16.gmra.mxu0 %v4809_v60  ;;  %2539 = vmatpush.bf16.msrb.mxu1 %v3649_v22  ;;  %v4340_v22 = vld [vmem:[#allocation10 + $0x16c] sm:$0xf0]  ;;  %v3408_v14 = vld [vmem:[#allocation10] sm:$0xf] }
  0x9b   :  { %990 = vmatmul.bf16.gmra.mxu1 %v4811_v3  ;;  %2526 = vmatpush.bf16.msrb.mxu0 %v3521_v17  ;;  %v3856_v17 = vld [vmem:[#allocation10 + $0x380] sm:$0xf] }
  0x9c   :  { %1019 = vmatmul.bf16.gmra.mxu2 %v4769_v26  ;;  %v3905_v26 = vor.u32 %v4420_v23, %v3904_v41  ;;  %v3857_v40 = vor.u32 %v4408_v18, %v3856_v17  ;;  %v4825_v41 = vld [vmem:[#allocation8] sm:$0x3]  ;;  %v3585_v23 = vor.u32 %v4340_v22, %v3584_v20  ;;  %v4328_v18 = vld [vmem:[#allocation10 + $0x10c] sm:$0xf0]  ;;  %v3792_v20 = vld [vmem:[#allocation10 + $0x300] sm:$0xf] }
  0x9d   :  { %1048 = vmatmul.bf16.gmra.mxu3 %v4771_v34  ;;  %v4320_v34 = vld [vmem:[#allocation10 + $0xcc] sm:$0xf0]  ;;  %2555 = vmatpush.bf16.msrb.mxu2 %v3729_v16  ;;  %v3536_v16 = vld [vmem:[#allocation10 + $0x100] sm:$0xf] }
  0x9e   :  { %v3505_v31 = vor.u32 %v4320_v34, %v3504_v25  ;;  %2565 = vmatpush.bf16.msrb.mxu3 %v3905_v26  ;;  %2540 = vmatpush.bf16.msrb.mxu1 %v3633_v38  ;;  %v3840_v26 = vld [vmem:[#allocation10 + $0x360] sm:$0xf]  ;;  %v4404_v25 = vld [vmem:[#allocation10 + $0x36c] sm:$0xf0]  ;;  %v4828_v38 = vperm.slane %v4825_v41, 0 }
  0x9f   :  { %v3841_v34 = vor.u32 %v4404_v25, %v3840_v26  ;;  %v4032_v22 = vld [vmem:[#allocation10 + $0x4e0] sm:$0xf] }
  0xa0   :  { %2527 = vmatpush.bf16.msrb.mxu0 %v3505_v31  ;;  %v4304_v31 = vld [vmem:[#allocation10 + $0x4c] sm:$0xf0]  ;;  %v4016_v45 = vld [vmem:[#allocation10 + $0x4c0] sm:$0xf] }
  0xa1   :  { %v3441_v44 = vor.u32 %v4304_v31, %v3440_v28  ;;  %v4322_v28 = vld [vmem:[#allocation10 + $0xe4] sm:$0xf]  ;;  %v3522_v31 = vld [vmem:[#allocation10 + $0xf0] sm:$0xf0]  ;;  %v4017_v55 = vor.u32 %v4448_v46, %v4016_v45  ;;  %v4468_v45 = vld [vmem:[#allocation10 + $0x56c] sm:$0xf0] }
  0xa2   :  { %2566 = vmatpush.bf16.msrb.mxu3 %v3889_v47  ;;  %2541 = vmatpush.bf16.msrb.mxu1 %v3617_v62  ;;  %v3569_v47 = vor.u32 %v4336_v30, %v3568_v29  ;;  %v4354_v29 = vld [vmem:[#allocation10 + $0x1e4] sm:$0xf]  ;;  %v3525_v37 = vor.u32 %v4322_v28, %v3522_v31  ;;  %v3458_v46 = vld [vmem:[#allocation10 + $0x70] sm:$0xf0] }
  0xa4   :  { %2528 = vmatpush.bf16.msrb.mxu0 %v3489_v53  ;;  %v3424_v53 = vld [vmem:[#allocation10 + $0x20] sm:$0xf] }
  0xa5   :  { %v3425_v2 = vor.u32 %v4300_v54, %v3424_v53  ;;  %v4318_v53 = vld [vmem:[#allocation10 + $0xc4] sm:$0xf] }
  0xa6   :  { %2567 = vmatpush.bf16.msrb.mxu3 %v3873_v7  ;;  %2542 = vmatpush.bf16.msrb.mxu1 %v3601_v15  ;;  %v4364_v7 = vld [vmem:[#allocation10 + $0x22c] sm:$0xf0] }
  0xa7   :  { %v3681_v9 = vor.u32 %v4364_v7, %v3680_v6  ;;  %v4296_v15 = vld [vmem:[#allocation10 + $0xc] sm:$0xf0] }
  0xa8   :  { %2529 = vmatpush.bf16.msrb.mxu0 %v3473_v11  ;;  %v4396_v11 = vld [vmem:[#allocation10 + $0x32c] sm:$0xf0]  ;;  %v3409_v17 = vor.u32 %v4296_v15, %v3408_v14  ;;  %v3490_v14 = vld [vmem:[#allocation10 + $0xb0] sm:$0xf0] }
  0xa9   :  { %v3809_v13 = vor.u32 %v4396_v11, %v3808_v10  ;;  %v4128_v10 = vld [vmem:[#allocation10 + $0x5a0] sm:$0xf] }
  0xaa   :  { %966 = vmatmul.bf16.gmra.mxu0 %v4817_v48  ;;  %2568 = vmatpush.bf16.msrb.mxu3 %v3857_v40  ;;  %v3664_v40 = vld [vmem:[#allocation10 + $0x200] sm:$0xf] }
  0xab   :  { %995 = vmatmul.bf16.gmra.mxu1 %v4819_v49 }
  0xac   :  { %1024 = vmatmul.bf16.gmra.mxu2 %v4781_v56  ;;  %v4308_v56 = vld [vmem:[#allocation10 + $0x6c] sm:$0xf0]  ;;  %2543 = vmatpush.bf16.msrb.mxu1 %v3585_v23 }
  0xad   :  { %1053 = vmatmul.bf16.gmra.mxu3 %v4783_v57  ;;  %v3457_v21 = vor.u32 %v4308_v56, %v3456_v19  ;;  %v3712_v57 = vld [vmem:[#allocation10 + $0x260] sm:$0xf]  ;;  %v4360_v19 = vld [vmem:[#allocation10 + $0x20c] sm:$0xf0]  ;;  %v3537_v56 = vor.u32 %v4328_v18, %v3536_v16  ;;  %v4346_v18 = vld [vmem:[#allocation10 + $0x1a4] sm:$0xf] }
  0xae   :  { %v3713_v24 = vor.u32 %v4372_v27, %v3712_v57  ;;  %2569 = vmatpush.bf16.msrb.mxu3 %v3841_v34  ;;  %v4452_v57 = vld [vmem:[#allocation10 + $0x4ec] sm:$0xf0]  ;;  %v4160_v27 = vld [vmem:[#allocation10 + $0x5e0] sm:$0xf] }
  0xaf   :  { %2530 = vmatpush.bf16.msrb.mxu0 %v3457_v21  ;;  %v4392_v21 = vld [vmem:[#allocation10 + $0x30c] sm:$0xf0]  ;;  %v4033_v25 = vor.u32 %v4452_v57, %v4032_v22  ;;  %v4112_v57 = vld [vmem:[#allocation10 + $0x580] sm:$0xf] }
  0xb0   :  { %2556 = vmatpush.bf16.msrb.mxu2 %v3713_v24  ;;  %2544 = vmatpush.bf16.msrb.mxu1 %v3569_v47  ;;  %v4484_v23 = vld [vmem:[#allocation10 + $0x5ec] sm:$0xf0] }
  0xb1   :  { %v4161_v34 = vor.u32 %v4484_v23, %v4160_v27 }
  0xb2   :  { %2570 = vmatpush.bf16.msrb.mxu3 %v3825_v51  ;;  %v4144_v51 = vld [vmem:[#allocation10 + $0x5c0] sm:$0xf] }
  0xb3   :  { %2531 = vmatpush.bf16.msrb.mxu0 %v3441_v44  ;;  %v3650_v44 = vld [vmem:[#allocation10 + $0x1f0] sm:$0xf0] }
  0xb4   :  { %2557 = vmatpush.bf16.msrb.mxu2 %v3697_v50  ;;  %2545 = vmatpush.bf16.msrb.mxu1 %v3553_v8  ;;  %v3653_v50 = vor.u32 %v4354_v29, %v3650_v44  ;;  %v4000_v8 = vld [vmem:[#allocation10 + $0x4a0] sm:$0xf] }
  0xb6   :  { %2571 = vmatpush.bf16.msrb.mxu3 %v3809_v13  ;;  %v4314_v13 = vld [vmem:[#allocation10 + $0xa4] sm:$0xf] }
  0xb7   :  { %v836_v52 = vpop.f32.mrf.mxu0  ;;  %2532 = vmatpush.bf16.msrb.mxu0 %v3425_v2  ;;  %v3634_v2 = vld [vmem:[#allocation10 + $0x1d0] sm:$0xf0]  ;;  %v3493_v22 = vor.u32 %v4314_v13, %v3490_v14  ;;  %v4334_v13 = vld [vmem:[#allocation10 + $0x144] sm:$0xf] }
  0xb8   :  { %v837_v61 = vadd.f32 %v836_v52, %v4828_v38  ;;  %v865_v62 = vpop.f32.mrf.mxu1  ;;  %2558 = vmatpush.bf16.msrb.mxu2 %v3681_v9  ;;  %2546 = vmatpush.bf16.msrb.mxu1 %v3537_v56  ;;  %v4480_v52 = vld [vmem:[#allocation10 + $0x5cc] sm:$0xf0]  ;;  %v3570_v14 = vld [vmem:[#allocation10 + $0x150] sm:$0xf0] }
  0xb9   :  { %v4145_v4 = vor.u32 %v4480_v52, %v4144_v51  ;;  %v4444_v9 = vld [vmem:[#allocation10 + $0x4ac] sm:$0xf0]  ;;  %v4338_v52 = vld [vmem:[#allocation10 + $0x164] sm:$0xf] }
  0xba   :  { %v866_v12 = vadd.f32 %v865_v62, %v837_v61  ;;  %1067 = vmatmul.bf16.vlgmr.msra.gmra.mxu0 %v4749_v42  ;;  %v3665_v42 = vor.u32 %v4360_v19, %v3664_v40  ;;  %v3506_v61 = vld [vmem:[#allocation10 + $0xd0] sm:$0xf0]  ;;  %v4350_v62 = vld [vmem:[#allocation10 + $0x1c4] sm:$0xf] }
  0xbb   :  { %1096 = vmatmul.bf16.vlgmr.msra.gmra.mxu1 %v4751_v43  ;;  %2533 = vmatpush.bf16.msrb.mxu0 %v3409_v17  ;;  %v3509_v6 = vor.u32 %v4318_v53, %v3506_v61  ;;  %v3637_v7 = vor.u32 %v4350_v62, %v3634_v2  ;;  %v3618_v40 = vld [vmem:[#allocation10 + $0x1b0] sm:$0xf0] }
  0xbc   :  { %1125 = vmatmul.bf16.vlgmr.msra.gmra.mxu2 %v4793_v0  ;;  %v3793_v0 = vor.u32 %v4392_v21, %v3792_v20  ;;  %2591 = vmatpush.bf16.msra.mxu1 %v4161_v34  ;;  %v3621_v23 = vor.u32 %v4346_v18, %v3618_v40  ;;  %v3602_v34 = vld [vmem:[#allocation10 + $0x190] sm:$0xf0]  ;;  %v3936_v18 = vld [vmem:[#allocation10 + $0x420] sm:$0xf]  ;;  %v4428_v40 = vld [vmem:[#allocation10 + $0x42c] sm:$0xf0] }
  0xbd   :  { %1154 = vmatmul.bf16.vlgmr.msra.gmra.mxu3 %v4795_v1  ;;  %2559 = vmatpush.bf16.msrb.mxu2 %v3665_v42  ;;  %v4001_v42 = vor.u32 %v4444_v9, %v4000_v8 }
  0xbe   :  { %2572 = vmatpush.bf16.msrb.mxu3 %v3793_v0  ;;  %v4440_v0 = vld [vmem:[#allocation10 + $0x48c] sm:$0xf0] }
  0xbf   :  { %v894_v43 = vpop.f32.mrf.mxu2  ;;  %v838_v26 = vpop.f32.mrf.mxu0  ;;  %2578 = vmatpush.bf16.msra.mxu0 %v4033_v25  ;;  %v4342_v25 = vld [vmem:[#allocation10 + $0x184] sm:$0xf] }
  0xc0   :  { %v895_v24 = vadd.f32 %v894_v43, %v866_v12  ;;  %v923_v1 = vpop.f32.mrf.mxu3  ;;  %v839_v30 = vadd.f32 %v838_v26, %v4828_v38  ;;  %v867_v33 = vpop.f32.mrf.mxu1  ;;  %v4476_v12 = vld [vmem:[#allocation10 + $0x5ac] sm:$0xf0]  ;;  %2592 = vmatpush.bf16.msra.mxu1 %v4145_v4  ;;  %v3984_v43 = vld [vmem:[#allocation10 + $0x480] sm:$0xf]  ;;  %v3474_v26 = vld [vmem:[#allocation10 + $0x90] sm:$0xf0]  ;;  %v3605_v44 = vor.u32 %v4342_v25, %v3602_v34  ;;  %v3937_v25 = vor.u32 %v4428_v40, %v3936_v18 }
  0xc1   :  { %2604 = vmatpush.bf16.msra.mxu2 %v3525_v37  ;;  %v4129_v21 = vor.u32 %v4476_v12, %v4128_v10  ;;  %v3985_v28 = vor.u32 %v4440_v0, %v3984_v43  ;;  %v3952_v4 = vld [vmem:[#allocation10 + $0x440] sm:$0xf]  ;;  %v4464_v10 = vld [vmem:[#allocation10 + $0x54c] sm:$0xf0]  ;;  %v3442_v12 = vld [vmem:[#allocation10 + $0x50] sm:$0xf0] }
  0xc2   :  { %v4836_v47 = vadd.f32 %v923_v1, %v895_v24  ;;  %v868_v54 = vadd.f32 %v867_v33, %v839_v30  ;;  %2617 = vmatpush.bf16.msra.mxu3 %v3653_v50  ;;  %v4472_v24 = vld [vmem:[#allocation10 + $0x58c] sm:$0xf0]  ;;  %v4310_v1 = vld [vmem:[#allocation10 + $0x84] sm:$0xf]  ;;  %v3968_v30 = vld [vmem:[#allocation10 + $0x460] sm:$0xf] }
  0xc3   :  { %2579 = vmatpush.bf16.msra.mxu0 %v4017_v55  ;;  %v4113_v31 = vor.u32 %v4472_v24, %v4112_v57  ;;  %v3477_v29 = vor.u32 %v4310_v1, %v3474_v26  ;;  %v4096_v33 = vld [vmem:[#allocation10 + $0x560] sm:$0xf]  ;;  %v3426_v43 = vld [vmem:[#allocation10 + $0x30] sm:$0xf0] }
  0xc4   :  { %2593 = vmatpush.bf16.msra.mxu1 %v4129_v21  ;;  %v4097_v62 = vor.u32 %v4468_v45, %v4096_v33  ;;  %v4460_v21 = vld [vmem:[#allocation10 + $0x52c] sm:$0xf0]  ;;  %v3554_v24 = vld [vmem:[#allocation10 + $0x130] sm:$0xf0]  ;;  %v4294_v45 = vld [vmem:[#allocation10 + $0x4] sm:$0xf] }
  0xc5   :  { %2605 = vmatpush.bf16.msra.mxu2 %v3509_v6  ;;  %v4432_v6 = vld [vmem:[#allocation10 + $0x44c] sm:$0xf0] }
  0xc6   :  { %2618 = vmatpush.bf16.msra.mxu3 %v3637_v7  ;;  %v4080_v7 = vld [vmem:[#allocation10 + $0x540] sm:$0xf] }
  0xc7   :  { %v896_v11 = vpop.f32.mrf.mxu2  ;;  %v841_v17 = vpop.f32.mrf.mxu0  ;;  %2580 = vmatpush.bf16.msra.mxu0 %v4001_v42  ;;  %v3573_v42 = vor.u32 %v4334_v13, %v3570_v14 }
  0xc8   :  { %v897_v15 = vadd.f32 %v896_v11, %v868_v54  ;;  %v925_v16 = vpop.f32.mrf.mxu3  ;;  %v842_v19 = vadd.f32 %v841_v17, %v4828_v38  ;;  %v870_v56 = vpop.f32.mrf.mxu1  ;;  %2594 = vmatpush.bf16.msra.mxu1 %v4113_v31  ;;  %v4302_v11 = vld [vmem:[#allocation10 + $0x44] sm:$0xf] }
  0xc9   :  { %2606 = vmatpush.bf16.msra.mxu2 %v3493_v22  ;;  %v3445_v17 = vor.u32 %v4302_v11, %v3442_v12  ;;  %v4298_v22 = vld [vmem:[#allocation10 + $0x24] sm:$0xf] }
  0xca   :  { %v4839_v20 = vadd.f32 %v925_v16, %v897_v15  ;;  %v871_v27 = vadd.f32 %v870_v56, %v842_v19  ;;  %1072 = vmatmul.bf16.gmra.mxu0 %v4761_v32  ;;  %v4436_v32 = vld [vmem:[#allocation10 + $0x46c] sm:$0xf0]  ;;  %2619 = vmatpush.bf16.msra.mxu3 %v3621_v23  ;;  %v3953_v15 = vor.u32 %v4432_v6, %v3952_v4  ;;  %v4064_v19 = vld [vmem:[#allocation10 + $0x520] sm:$0xf]  ;;  %v4330_v23 = vld [vmem:[#allocation10 + $0x124] sm:$0xf] }
  0xcb   :  { %1101 = vmatmul.bf16.gmra.mxu1 %v4763_v35  ;;  %v4306_v35 = vld [vmem:[#allocation10 + $0x64] sm:$0xf]  ;;  %2581 = vmatpush.bf16.msra.mxu0 %v3985_v28  ;;  %v3969_v55 = vor.u32 %v4436_v32, %v3968_v30  ;;  %v4081_v16 = vor.u32 %v4464_v10, %v4080_v7  ;;  %v4065_v28 = vor.u32 %v4460_v21, %v4064_v19  ;;  %v4424_v30 = vld [vmem:[#allocation10 + $0x40c] sm:$0xf0]  ;;  %v4048_v32 = vld [vmem:[#allocation10 + $0x500] sm:$0xf] }
  0xcc   :  { %1130 = vmatmul.bf16.gmra.mxu2 %v4801_v63  ;;  %v3461_v2 = vor.u32 %v4306_v35, %v3458_v46  ;;  %2595 = vmatpush.bf16.msra.mxu1 %v4097_v62  ;;  %v3429_v31 = vor.u32 %v4298_v22, %v3426_v43  ;;  %v3410_v35 = vld [vmem:[#allocation10 + $0x10] sm:$0xf0]  ;;  %v4326_v46 = vld [vmem:[#allocation10 + $0x104] sm:$0xf] }
  0xcd   :  { %1159 = vmatmul.bf16.gmra.mxu3 %v4803_v5  ;;  %v3586_v5 = vld [vmem:[#allocation10 + $0x170] sm:$0xf0]  ;;  %2607 = vmatpush.bf16.msra.mxu2 %v3477_v29  ;;  %v3920_v29 = vld [vmem:[#allocation10 + $0x400] sm:$0xf]  ;;  %v4450_v22 = vld [vmem:[#allocation10 + $0x4e4] sm:$0xf] }
  0xce   :  { %2620 = vmatpush.bf16.msra.mxu3 %v3605_v44  ;;  %v3589_v9 = vor.u32 %v4338_v52, %v3586_v5  ;;  %v4456_v44 = vld [vmem:[#allocation10 + $0x50c] sm:$0xf0]  ;;  %v3413_v52 = vor.u32 %v4294_v45, %v3410_v35  ;;  %v3906_v21 = vld [vmem:[#allocation10 + $0x3f0] sm:$0xf0] }
  0xcf   :  { %v899_v37 = vpop.f32.mrf.mxu2  ;;  %v843_v51 = vpop.f32.mrf.mxu0  ;;  %2582 = vmatpush.bf16.msra.mxu0 %v3969_v55  ;;  %v4034_v43 = vld [vmem:[#allocation10 + $0x4f0] sm:$0xf0] }
  0xd0   :  { %v900_v63 = vadd.f32 %v899_v37, %v871_v27  ;;  %v928_v50 = vpop.f32.mrf.mxu3  ;;  %v844_v53 = vadd.f32 %v843_v51, %v4828_v38  ;;  %v872_v54 = vpop.f32.mrf.mxu1  ;;  %2596 = vmatpush.bf16.msra.mxu1 %v4081_v16  ;;  %v3557_v37 = vor.u32 %v4330_v23, %v3554_v24  ;;  %v4049_v51 = vor.u32 %v4456_v44, %v4048_v32  ;;  %v4482_v24 = vld [vmem:[#allocation10 + $0x5e4] sm:$0xf]  ;;  %v3890_v35 = vld [vmem:[#allocation10 + $0x3d0] sm:$0xf0] }
  0xd1   :  { %2608 = vmatpush.bf16.msra.mxu2 %v3461_v2  ;;  %v4382_v32 = vld [vmem:[#allocation10 + $0x2c4] sm:$0xf] }
  0xd2   :  { %v4846_v61 = vadd.f32 %v928_v50, %v900_v63  ;;  %v873_v8 = vadd.f32 %v872_v54, %v844_v53  ;;  %2621 = vmatpush.bf16.msra.mxu3 %v3589_v9  ;;  %v3538_v63 = vld [vmem:[#allocation10 + $0x110] sm:$0xf0]  ;;  %v3921_v50 = vor.u32 %v4424_v30, %v3920_v29  ;;  %v4037_v30 = vor.u32 %v4450_v22, %v4034_v43  ;;  %v4406_v43 = vld [vmem:[#allocation10 + $0x384] sm:$0xf] }
  0xd3   :  { %2583 = vmatpush.bf16.msra.mxu0 %v3953_v15  ;;  %v3541_v5 = vor.u32 %v4326_v46, %v3538_v63  ;;  %v1340_v15 = vld [vmem:[#allocation5] sm:$0xff]  ;;  %v4018_v63 = vld [vmem:[#allocation10 + $0x4d0] sm:$0xf0] }
  0xd4   :  { %2597 = vmatpush.bf16.msra.mxu1 %v4065_v28  ;;  %v1548_v18 = vunpack.c.l.b16 %v1340_v15  ;;  %v1549_v40 = vunpack.c.h.b16 %v1340_v15  ;;  %v4446_v46 = vld [vmem:[#allocation10 + $0x4c4] sm:$0xf]  ;;  %v3730_v22 = vld [vmem:[#allocation10 + $0x290] sm:$0xf0] }
  0xd5   :  { %2609 = vmatpush.bf16.msra.mxu2 %v3445_v17  ;;  %v1341_v17 = vld [vmem:[#allocation5 + $0x8] sm:$0xff]  ;;  %v4474_v15 = vld [vmem:[#allocation10 + $0x5a4] sm:$0xf] }
  0xd6   :  { %2622 = vmatpush.bf16.msra.mxu3 %v3573_v42  ;;  %v1550_v19 = vunpack.c.l.b16 %v1341_v17  ;;  %v4418_v42 = vld [vmem:[#allocation10 + $0x3e4] sm:$0xf] }
  0xd7   :  { %v901_v56 = vpop.f32.mrf.mxu2  ;;  %v846_v27 = vpop.f32.mrf.mxu0  ;;  %2584 = vmatpush.bf16.msra.mxu0 %v3937_v25  ;;  %v3909_v29 = vor.u32 %v4418_v42, %v3906_v21 }
  0xd8   :  { %v902_v0 = vadd.f32 %v901_v56, %v873_v8  ;;  %v930_v57 = vpop.f32.mrf.mxu3  ;;  %v847_v1 = vadd.f32 %v846_v27, %v4828_v38  ;;  %v875_v26 = vpop.f32.mrf.mxu1  ;;  %2598 = vmatpush.bf16.msra.mxu1 %v4049_v51  ;;  %v4386_v56 = vld [vmem:[#allocation10 + $0x2e4] sm:$0xf]  ;;  %v4881_v27 = vpack.c.b16 %v1549_v40, %v1549_v40  ;;  %v4883_v23 = vpack.c.b16 %v1550_v19, %v1550_v19  ;;  %v4146_v51 = vld [vmem:[#allocation10 + $0x5d0] sm:$0xf0] }
  0xd9   :  { %2610 = vmatpush.bf16.msra.mxu2 %v3429_v31 }
  0xda   :  { %v4849_v34 = vadd.f32 %v930_v57, %v902_v0  ;;  %v876_v33 = vadd.f32 %v875_v26, %v847_v1  ;;  %1077 = vmatmul.bf16.gmra.mxu0 %v4773_v36  ;;  %2623 = vmatpush.bf16.msra.mxu3 %v3557_v37  ;;  %v4162_v1 = vld [vmem:[#allocation10 + $0x5f0] sm:$0xf0]  ;;  %v4414_v37 = vld [vmem:[#allocation10 + $0x3c4] sm:$0xf] }
  0xdb   :  { %1106 = vmatmul.bf16.gmra.mxu1 %v4775_v39  ;;  %2585 = vmatpush.bf16.msra.mxu0 %v3921_v50  ;;  %v4165_v45 = vor.u32 %v4482_v24, %v4162_v1  ;;  %v4478_v50 = vld [vmem:[#allocation10 + $0x5c4] sm:$0xf] }
  0xdc   :  { %1135 = vmatmul.bf16.gmra.mxu2 %v4809_v60 }
  0xdd   :  { %1164 = vmatmul.bf16.gmra.mxu3 %v4811_v3  ;;  %2611 = vmatpush.bf16.msra.mxu2 %v3413_v52 }
  0xde   :  { %2624 = vmatpush.bf16.msra.mxu3 %v3541_v5  ;;  %v3893_v5 = vor.u32 %v4414_v37, %v3890_v35  ;;  %v4370_v35 = vld [vmem:[#allocation10 + $0x264] sm:$0xf] }
  0xdf   :  { %v904_v36 = vpop.f32.mrf.mxu2  ;;  %v848_v55 = vpop.f32.mrf.mxu0 }
  0xe0   :  { %v905_v53 = vadd.f32 %v904_v36, %v876_v33  ;;  %v933_v54 = vpop.f32.mrf.mxu3  ;;  %v849_v39 = vadd.f32 %v848_v55, %v4828_v38  ;;  %v877_v62 = vpop.f32.mrf.mxu1  ;;  %v3762_v33 = vld [vmem:[#allocation10 + $0x2d0] sm:$0xf0] }
  0xe1   :  { %v3765_v36 = vor.u32 %v4382_v32, %v3762_v33  ;;  %v3746_v55 = vld [vmem:[#allocation10 + $0x2b0] sm:$0xf0] }
  0xe2   :  { %v4856_v60 = vadd.f32 %v933_v54, %v905_v53  ;;  %v878_v3 = vadd.f32 %v877_v62, %v849_v39  ;;  %v4021_v53 = vor.u32 %v4446_v46, %v4018_v63  ;;  %v4378_v54 = vld [vmem:[#allocation10 + $0x2a4] sm:$0xf]  ;;  %v3714_v46 = vld [vmem:[#allocation10 + $0x270] sm:$0xf0] }
  0xe3   :  { %v4410_v39 = vld [vmem:[#allocation10 + $0x3a4] sm:$0xf] }
  0xe4   :  { %v4402_v63 = vld [vmem:[#allocation10 + $0x364] sm:$0xf] }
  0xe7   :  { %v906_v2 = vpop.f32.mrf.mxu2  ;;  %v851_v7 = vpop.f32.mrf.mxu0 }
  0xe8   :  { %v907_v4 = vadd.f32 %v906_v2, %v878_v3  ;;  %v935_v6 = vpop.f32.mrf.mxu3  ;;  %v852_v8 = vadd.f32 %v851_v7, %v4828_v38  ;;  %v880_v9 = vpop.f32.mrf.mxu1  ;;  %v4149_v2 = vor.u32 %v4478_v50, %v4146_v51 }
  0xea   :  { %v4859_v10 = vadd.f32 %v935_v6, %v907_v4  ;;  %v4861_v11 = vadd.f32 %v880_v9, %v852_v8  ;;  %1082 = vmatmul.bf16.gmra.mxu0 %v4785_v58  ;;  %v1551_v58 = vunpack.c.h.b16 %v1341_v17  ;;  %v4442_v4 = vld [vmem:[#allocation10 + $0x4a4] sm:$0xf]  ;;  %v4002_v6 = vld [vmem:[#allocation10 + $0x4b0] sm:$0xf0] }
  0xeb   :  { %1111 = vmatmul.bf16.gmra.mxu1 %v4787_v59  ;;  %v3778_v59 = vld [vmem:[#allocation10 + $0x2f0] sm:$0xf0]  ;;  %v4005_v21 = vor.u32 %v4442_v4, %v4002_v6 }
  0xec   :  { %1140 = vmatmul.bf16.gmra.mxu2 %v4817_v48  ;;  %v4886_v28 = vpack.c.b16 %v1551_v58, %v1551_v58  ;;  %v3781_v31 = vor.u32 %v4386_v56, %v3778_v59  ;;  %v4130_v17 = vld [vmem:[#allocation10 + $0x5b0] sm:$0xf0]  ;;  %v3749_v58 = vor.u32 %v4378_v54, %v3746_v55  ;;  %v4374_v56 = vld [vmem:[#allocation10 + $0x284] sm:$0xf] }
  0xed   :  { %1169 = vmatmul.bf16.gmra.mxu3 %v4819_v49  ;;  %v4877_v49 = vpack.c.b16 %v1548_v18, %v1548_v18  ;;  %v1342_v18 = vld [vmem:[#allocation5 + $0x10] sm:$0xff]  ;;  %v3733_v37 = vor.u32 %v4374_v56, %v3730_v22  ;;  %v4434_v54 = vld [vmem:[#allocation10 + $0x464] sm:$0xf] }
  0xee   :  { %v1553_v32 = vunpack.c.h.b16 %v1342_v18  ;;  %v3970_v55 = vld [vmem:[#allocation10 + $0x470] sm:$0xf0]  ;;  %v4430_v22 = vld [vmem:[#allocation10 + $0x444] sm:$0xf] }
  0xef   :  { %v4867_v12 = vpop.f32.mrf.mxu2  ;;  %v4871_v14 = vpop.f32.mrf.mxu0 }
  0xf0   :  { %v4869_v13 = vpop.f32.mrf.mxu3  ;;  %v4873_v16 = vpop.f32.mrf.mxu1  ;;  %v4905_v4 = vpack.c.b16 %v1553_v32, %v1553_v32 }
  0xf7   :  { %v4875_v48 = vpop.f32.mrf.mxu2  ;;  %v952_v57 = vpop.f32.mrf.mxu0 }
  0xf8   :  { %v4879_v0 = vpop.f32.mrf.mxu3  ;;  %v953_v26 = vadd.f32 %v952_v57, %v4836_v47  ;;  %v981_v25 = vpop.f32.mrf.mxu1  ;;  %v4892_v47 = vperm.slane %v4825_v41, 1  ;;  %v3874_v41 = vld [vmem:[#allocation10 + $0x3b0] sm:$0xf0] }
  0xf9   :  { %v3877_v42 = vor.u32 %v4410_v39, %v3874_v41  ;;  %v3858_v57 = vld [vmem:[#allocation10 + $0x390] sm:$0xf0] }
  0xfa   :  { %v982_v44 = vadd.f32 %v981_v25, %v953_v26  ;;  %2534 = vmatmul.bf16.vlgmr.msrb.gmra.mxu0 %v4877_v49  ;;  %v4133_v26 = vor.u32 %v4474_v15, %v4130_v17  ;;  %v4438_v25 = vld [vmem:[#allocation10 + $0x484] sm:$0xf]  ;;  %v4098_v41 = vld [vmem:[#allocation10 + $0x570] sm:$0xf0]  ;;  %v3973_v17 = vor.u32 %v4434_v54, %v3970_v55 }
  0xfb   :  { %2547 = vmatmul.bf16.vlgmr.msrb.gmra.mxu1 %v4881_v27  ;;  %2630 = vmatpush.bf16.msrb.mxu0 %v3781_v31  ;;  %v3986_v31 = vld [vmem:[#allocation10 + $0x490] sm:$0xf0]  ;;  %v4458_v54 = vld [vmem:[#allocation10 + $0x524] sm:$0xf] }
  0xfc   :  { %2560 = vmatmul.bf16.vlgmr.msrb.gmra.mxu2 %v4883_v23  ;;  %v1199_v52 = vrot.slane %v982_v44, 4  ;;  %2643 = vmatpush.bf16.msrb.mxu1 %v3909_v29  ;;  %v1552_v29 = vunpack.c.l.b16 %v1342_v18  ;;  %v3698_v18 = vld [vmem:[#allocation10 + $0x250] sm:$0xf0] }
  0xfd   :  { %2573 = vmatmul.bf16.vlgmr.msrb.gmra.mxu3 %v4886_v28  ;;  %2656 = vmatpush.bf16.msrb.mxu2 %v4037_v30  ;;  %v4114_v30 = vld [vmem:[#allocation10 + $0x590] sm:$0xf0] }
  0xfe   :  { %v1200_v62 = vmax.f32 %v982_v44, %v1199_v52  ;;  %2669 = vmatpush.bf16.msrb.mxu3 %v4165_v45  ;;  %v3861_v44 = vor.u32 %v4406_v43, %v3858_v57  ;;  %v3989_v45 = vor.u32 %v4438_v25, %v3986_v31  ;;  %v3954_v43 = vld [vmem:[#allocation10 + $0x450] sm:$0xf0] }
  0xff   :  { %v1010_v3 = vpop.f32.mrf.mxu2  ;;  %v954_v9 = vpop.f32.mrf.mxu0  ;;  %2631 = vmatpush.bf16.msrb.mxu0 %v3765_v36  ;;  %v4082_v57 = vld [vmem:[#allocation10 + $0x550] sm:$0xf0]  ;;  %v3957_v31 = vor.u32 %v4430_v22, %v3954_v43  ;;  %v4325_v43 = vld [vmem:[#allocation10 + $0xf4] sm:$0xf0] }
 0x100   :  { %v1011_v7 = vadd.f32 %v1010_v3, %v4892_v47  ;;  %v1039_v8 = vpop.f32.mrf.mxu3  ;;  %v955_v40 = vadd.f32 %v954_v9, %v4839_v20  ;;  %v983_v19 = vpop.f32.mrf.mxu1  ;;  %2644 = vmatpush.bf16.msrb.mxu1 %v3893_v5  ;;  %v1201_v24 = vrot.slane %v1200_v62, 2  ;;  %v4470_v20 = vld [vmem:[#allocation10 + $0x584] sm:$0xf]  ;;  %v4901_v5 = vpack.c.b16 %v1552_v29, %v1552_v29  ;;  %v4066_v55 = vld [vmem:[#allocation10 + $0x530] sm:$0xf0] }
 0x101   :  { %2657 = vmatpush.bf16.msrb.mxu2 %v4021_v53  ;;  %v4117_v36 = vor.u32 %v4470_v20, %v4114_v30  ;;  %v3842_v53 = vld [vmem:[#allocation10 + $0x370] sm:$0xf0]  ;;  %v4366_v9 = vld [vmem:[#allocation10 + $0x244] sm:$0xf] }
 0x102   :  { %v4897_v59 = vadd.f32 %v1039_v8, %v1011_v7  ;;  %2670 = vmatpush.bf16.msrb.mxu3 %v4149_v2  ;;  %v984_v1 = vadd.f32 %v983_v19, %v955_v40  ;;  %v1202_v50 = vmax.f32 %v1200_v62, %v1201_v24  ;;  %v4466_v2 = vld [vmem:[#allocation10 + $0x564] sm:$0xf]  ;;  %v3717_v8 = vor.u32 %v4370_v35, %v3714_v46  ;;  %v3826_v19 = vld [vmem:[#allocation10 + $0x350] sm:$0xf0] }
 0x103   :  { %2632 = vmatpush.bf16.msrb.mxu0 %v3749_v58  ;;  %v3845_v15 = vor.u32 %v4402_v63, %v3842_v53  ;;  %v4398_v40 = vld [vmem:[#allocation10 + $0x344] sm:$0xf]  ;;  %v3682_v20 = vld [vmem:[#allocation10 + $0x230] sm:$0xf0] }
 0x104   :  { %v1211_v33 = vrot.slane %v984_v1, 4  ;;  %2645 = vmatpush.bf16.msrb.mxu1 %v3877_v42  ;;  %v1203_v58 = vrot.slane %v1202_v50, 1  ;;  %v3829_v25 = vor.u32 %v4398_v40, %v3826_v19  ;;  %v4362_v29 = vld [vmem:[#allocation10 + $0x224] sm:$0xf]  ;;  %v3810_v35 = vld [vmem:[#allocation10 + $0x330] sm:$0xf0] }
 0x105   :  { %2658 = vmatpush.bf16.msrb.mxu2 %v4005_v21  ;;  %v4101_v21 = vor.u32 %v4466_v2, %v4098_v41  ;;  %v4394_v30 = vld [vmem:[#allocation10 + $0x324] sm:$0xf]  ;;  %v3938_v63 = vld [vmem:[#allocation10 + $0x430] sm:$0xf0] }
 0x106   :  { %v1212_v51 = vmax.f32 %v984_v1, %v1211_v33  ;;  %2671 = vmatpush.bf16.msrb.mxu3 %v4133_v26  ;;  %v3701_v26 = vor.u32 %v4366_v9, %v3698_v18  ;;  %v1204_v32 = vmax.f32 %v1202_v50, %v1203_v58  ;;  %v4426_v46 = vld [vmem:[#allocation10 + $0x424] sm:$0xf]  ;;  %v3794_v18 = vld [vmem:[#allocation10 + $0x310] sm:$0xf0] }
 0x107   :  { %v4899_v52 = vpop.f32.mrf.mxu2  ;;  %v957_v3 = vpop.f32.mrf.mxu0  ;;  %2633 = vmatpush.bf16.msrb.mxu0 %v3733_v37  ;;  %v4422_v40 = vld [vmem:[#allocation10 + $0x404] sm:$0xf]  ;;  %v3922_v19 = vld [vmem:[#allocation10 + $0x410] sm:$0xf0] }
 0x108   :  { %v4903_v39 = vpop.f32.mrf.mxu3  ;;  %v1213_v6 = vrot.slane %v1212_v51, 2  ;;  %v958_v62 = vadd.f32 %v957_v3, %v4846_v61  ;;  %v986_v7 = vpop.f32.mrf.mxu1  ;;  %2646 = vmatpush.bf16.msrb.mxu1 %v3861_v44  ;;  %v4462_v61 = vld [vmem:[#allocation10 + $0x544] sm:$0xf]  ;;  %v4050_v22 = vld [vmem:[#allocation10 + $0x510] sm:$0xf0] }
 0x109   :  { %2659 = vmatpush.bf16.msrb.mxu2 %v3989_v45  ;;  %v4085_v45 = vor.u32 %v4462_v61, %v4082_v57  ;;  %v4358_v3 = vld [vmem:[#allocation10 + $0x204] sm:$0xf]  ;;  %v3656_v61 = vld [vmem:[#allocation10 + $0x1e8] sm:$0xf]  ;;  %v4357_v57 = vld [vmem:[#allocation10 + $0x1f4] sm:$0xf0] }
 0x10a   :  { %v1214_v56 = vmax.f32 %v1212_v51, %v1213_v6  ;;  %2672 = vmatpush.bf16.msrb.mxu3 %v4117_v36  ;;  %v987_v42 = vadd.f32 %v986_v7, %v958_v62  ;;  %2586 = vmatmul.bf16.vlgmr.msra.gmra.mxu0 %v4901_v5  ;;  %v3685_v62 = vor.u32 %v4362_v29, %v3682_v20  ;;  %v3666_v7 = vld [vmem:[#allocation10 + $0x210] sm:$0xf0] }
 0x10b   :  { %2599 = vmatmul.bf16.vlgmr.msra.gmra.mxu1 %v4905_v4  ;;  %2634 = vmatpush.bf16.msrb.mxu0 %v3717_v8  ;;  %v4390_v8 = vld [vmem:[#allocation10 + $0x304] sm:$0xf]  ;;  %v3925_v20 = vor.u32 %v4422_v40, %v3922_v19 }
 0x10c   :  { %2612 = vmatmul.bf16.vlgmr.msra.gmra.mxu2 %v4877_v49  ;;  %v1215_v24 = vrot.slane %v1214_v56, 1  ;;  %v1223_v1 = vrot.slane %v987_v42, 4  ;;  %2647 = vmatpush.bf16.msrb.mxu1 %v3845_v15  ;;  %v3813_v15 = vor.u32 %v4394_v30, %v3810_v35  ;;  %v3797_v29 = vor.u32 %v4390_v8, %v3794_v18  ;;  %v3912_v30 = vld [vmem:[#allocation10 + $0x3e8] sm:$0xf]  ;;  %v4417_v18 = vld [vmem:[#allocation10 + $0x3d4] sm:$0xf0] }
 0x10d   :  { %2625 = vmatmul.bf16.vlgmr.msra.gmra.mxu3 %v4881_v27  ;;  %2660 = vmatpush.bf16.msrb.mxu2 %v3973_v17  ;;  %v3941_v17 = vor.u32 %v4426_v46, %v3938_v63  ;;  %v3512_v46 = vld [vmem:[#allocation10 + $0xc8] sm:$0xf] }
 0x10e   :  { %v1216_v33 = vmax.f32 %v1214_v56, %v1215_v24  ;;  %v1224_v37 = vmax.f32 %v987_v42, %v1223_v1  ;;  %2673 = vmatpush.bf16.msrb.mxu3 %v4101_v21  ;;  %v4069_v42 = vor.u32 %v4458_v54, %v4066_v55  ;;  %v4454_v21 = vld [vmem:[#allocation10 + $0x504] sm:$0xf]  ;;  %v4321_v54 = vld [vmem:[#allocation10 + $0xd4] sm:$0xf0]  ;;  %v3640_v55 = vld [vmem:[#allocation10 + $0x1c8] sm:$0xf] }
 0x10f   :  { %v1015_v44 = vpop.f32.mrf.mxu2  ;;  %v959_v53 = vpop.f32.mrf.mxu0  ;;  %2635 = vmatpush.bf16.msrb.mxu0 %v3701_v26  ;;  %v3669_v26 = vor.u32 %v4358_v3, %v3666_v7  ;;  %v4353_v3 = vld [vmem:[#allocation10 + $0x1d4] sm:$0xf0]  ;;  %v3768_v8 = vld [vmem:[#allocation10 + $0x2c8] sm:$0xf] }
 0x110   :  { %v1016_v51 = vadd.f32 %v1015_v44, %v4892_v47  ;;  %v1044_v36 = vpop.f32.mrf.mxu3  ;;  %v1316_v2 = vsel %vm1315_vm0, %v1216_v33, %v1204_v32  ;;  %v1225_v41 = vrot.slane %v1224_v37, 2  ;;  %v960_v50 = vadd.f32 %v959_v53, %v4849_v34  ;;  %v988_v6 = vpop.f32.mrf.mxu1  ;;  %2648 = vmatpush.bf16.msrb.mxu1 %v3829_v25  ;;  %v3528_v34 = vld [vmem:[#allocation10 + $0xe8] sm:$0xf]  ;;  %v4421_v32 = vld [vmem:[#allocation10 + $0x3f4] sm:$0xf0] }
 0x111   :  { %2661 = vmatpush.bf16.msrb.mxu2 %v3957_v31  ;;  %v3784_v25 = vld [vmem:[#allocation10 + $0x2e8] sm:$0xf]  ;;  %v4389_v31 = vld [vmem:[#allocation10 + $0x2f4] sm:$0xf0]  ;;  %v3529_v35 = vor.u32 %v4325_v43, %v3528_v34  ;;  %v3913_v7 = vor.u32 %v4421_v32, %v3912_v30 }
 0x112   :  { %v4915_v9 = vadd.f32 %v1044_v36, %v1016_v51  ;;  %v1226_v58 = vmax.f32 %v1224_v37, %v1225_v41  ;;  %2674 = vmatpush.bf16.msrb.mxu3 %v4085_v45  ;;  %v989_v56 = vadd.f32 %v988_v6, %v960_v50  ;;  %v4053_v45 = vor.u32 %v4454_v21, %v4050_v22  ;;  %v4317_v21 = vld [vmem:[#allocation10 + $0xb4] sm:$0xf0]  ;;  %v3480_v30 = vld [vmem:[#allocation10 + $0x88] sm:$0xf] }
 0x113   :  { %2636 = vmatpush.bf16.msrb.mxu0 %v3685_v62  ;;  %v3657_v36 = vor.u32 %v4357_v57, %v3656_v61  ;;  %v3785_v53 = vor.u32 %v4389_v31, %v3784_v25  ;;  %v4349_v22 = vld [vmem:[#allocation10 + $0x1b4] sm:$0xf0]  ;;  %v3752_v57 = vld [vmem:[#allocation10 + $0x2a8] sm:$0xf] }
 0x114   :  { %v1227_v24 = vrot.slane %v1226_v58, 1  ;;  %v1235_v1 = vrot.slane %v989_v56, 4  ;;  %2649 = vmatpush.bf16.msrb.mxu1 %v3813_v15  ;;  %v4385_v15 = vld [vmem:[#allocation10 + $0x2d4] sm:$0xf0] }
 0x115   :  { %2662 = vmatpush.bf16.msrb.mxu2 %v3941_v17  ;;  %v3896_v17 = vld [vmem:[#allocation10 + $0x3c8] sm:$0xf] }
 0x116   :  { %v1228_v33 = vmax.f32 %v1226_v58, %v1227_v24  ;;  %v1236_v37 = vmax.f32 %v989_v56, %v1235_v1  ;;  %2675 = vmatpush.bf16.msrb.mxu3 %v4069_v42  ;;  %v3513_v58 = vor.u32 %v4321_v54, %v3512_v46  ;;  %v3496_v56 = vld [vmem:[#allocation10 + $0xa8] sm:$0xf]  ;;  %v3769_v42 = vor.u32 %v4385_v15, %v3768_v8  ;;  %v4381_v24 = vld [vmem:[#allocation10 + $0x2b4] sm:$0xf0] }
 0x117   :  { %v4917_v44 = vpop.f32.mrf.mxu2  ;;  %v962_v51 = vpop.f32.mrf.mxu0  ;;  %2637 = vmatpush.bf16.msrb.mxu0 %v3669_v26  ;;  %v3897_v61 = vor.u32 %v4417_v18, %v3896_v17  ;;  %v3880_v1 = vld [vmem:[#allocation10 + $0x3a8] sm:$0xf]  ;;  %v4413_v26 = vld [vmem:[#allocation10 + $0x3b4] sm:$0xf0]  ;;  %v854_v18 = vadd.f32 %v4871_v14, %v4828_v38 }
 0x118   :  { %v4919_v63 = vpop.f32.mrf.mxu3  ;;  %v1318_v41 = vsel %vm1317_vm1, %v1228_v33, %v1316_v2  ;;  %v1237_v50 = vrot.slane %v1236_v37, 2  ;;  %v963_v6 = vadd.f32 %v962_v51, %v4856_v60  ;;  %v991_v62 = vpop.f32.mrf.mxu1  ;;  %2650 = vmatpush.bf16.msrb.mxu1 %v3797_v29  ;;  %v3641_v2 = vor.u32 %v4353_v3, %v3640_v55  ;;  %v3624_v60 = vld [vmem:[#allocation10 + $0x1a8] sm:$0xf]  ;;  %v4313_v46 = vld [vmem:[#allocation10 + $0x94] sm:$0xf0] }
 0x119   :  { %2663 = vmatpush.bf16.msrb.mxu2 %v3925_v20  ;;  %v3497_v20 = vor.u32 %v4317_v21, %v3496_v56  ;;  %v3608_v51 = vld [vmem:[#allocation10 + $0x188] sm:$0xf]  ;;  %v4409_v17 = vld [vmem:[#allocation10 + $0x394] sm:$0xf0] }
 0x11a   :  { %v1238_v40 = vmax.f32 %v1236_v37, %v1237_v50  ;;  %2676 = vmatpush.bf16.msrb.mxu3 %v4053_v45  ;;  %v992_v19 = vadd.f32 %v991_v62, %v963_v6  ;;  %2638 = vmatmul.bf16.vlgmr.msrb.gmra.mxu0 %v4883_v23  ;;  %v3625_v45 = vor.u32 %v4349_v22, %v3624_v60  ;;  %v3736_v6 = vld [vmem:[#allocation10 + $0x288] sm:$0xf]  ;;  %v4377_v62 = vld [vmem:[#allocation10 + $0x294] sm:$0xf0] }
 0x11b   :  { %2682 = vmatpush.bf16.msra.mxu0 %v3529_v35  ;;  %2651 = vmatmul.bf16.vlgmr.msrb.gmra.mxu1 %v4886_v28  ;;  %v3753_v35 = vor.u32 %v4381_v24, %v3752_v57  ;;  %v3881_v50 = vor.u32 %v4413_v26, %v3880_v1  ;;  %v3864_v15 = vld [vmem:[#allocation10 + $0x388] sm:$0xf]  ;;  %v3737_v56 = vor.u32 %v4377_v62, %v3736_v6  ;;  %v4341_v21 = vld [vmem:[#allocation10 + $0x174] sm:$0xf0] }
 0x11c   :  { %2695 = vmatpush.bf16.msra.mxu1 %v3657_v36  ;;  %v1239_v34 = vrot.slane %v1238_v40, 1  ;;  %v1247_v43 = vrot.slane %v992_v19, 4  ;;  %2664 = vmatmul.bf16.vlgmr.msrb.gmra.mxu2 %v4901_v5  ;;  %v4345_v36 = vld [vmem:[#allocation10 + $0x194] sm:$0xf0]  ;;  %v3865_v60 = vor.u32 %v4409_v17, %v3864_v15  ;;  %v3720_v22 = vld [vmem:[#allocation10 + $0x268] sm:$0xf] }
 0x11d   :  { %2708 = vmatpush.bf16.msra.mxu2 %v3785_v53  ;;  %2677 = vmatmul.bf16.vlgmr.msrb.gmra.mxu3 %v4905_v4  ;;  %v3848_v14 = vld [vmem:[#allocation10 + $0x368] sm:$0xf] }
 0x11e   :  { %2721 = vmatpush.bf16.msra.mxu3 %v3913_v7  ;;  %v1240_v25 = vmax.f32 %v1238_v40, %v1239_v34  ;;  %v1248_v31 = vmax.f32 %v992_v19, %v1247_v43  ;;  %v910_v7 = vadd.f32 %v4867_v12, %v4861_v11  ;;  %v3481_v19 = vor.u32 %v4313_v46, %v3480_v30  ;;  %v4373_v34 = vld [vmem:[#allocation10 + $0x274] sm:$0xf0]  ;;  %v3432_v17 = vld [vmem:[#allocation10 + $0x28] sm:$0xf] }
 0x11f   :  { %2683 = vmatpush.bf16.msra.mxu0 %v3513_v58  ;;  %v1020_v29 = vpop.f32.mrf.mxu2  ;;  %v964_v37 = vpop.f32.mrf.mxu0  ;;  %v3464_v58 = vld [vmem:[#allocation10 + $0x68] sm:$0xf]  ;;  %v4405_v43 = vld [vmem:[#allocation10 + $0x374] sm:$0xf0] }
 0x120   :  { %2696 = vmatpush.bf16.msra.mxu1 %v3641_v2  ;;  %v1021_v32 = vadd.f32 %v1020_v29, %v4892_v47  ;;  %v1049_v33 = vpop.f32.mrf.mxu3  ;;  %v1320_v53 = vsel %vm1319_vm2, %v1240_v25, %v1318_v41  ;;  %v1249_v54 = vrot.slane %v1248_v31, 2  ;;  %v965_v55 = vadd.f32 %v964_v37, %v4859_v10  ;;  %v993_v3 = vpop.f32.mrf.mxu1  ;;  %v4309_v2 = vld [vmem:[#allocation10 + $0x74] sm:$0xf0]  ;;  %v3448_v25 = vld [vmem:[#allocation10 + $0x48] sm:$0xf] }
 0x121   :  { %2709 = vmatpush.bf16.msra.mxu2 %v3769_v42  ;;  %v3609_v10 = vor.u32 %v4345_v36, %v3608_v51  ;;  %v3592_v42 = vld [vmem:[#allocation10 + $0x168] sm:$0xf]  ;;  %v939_v38 = vadd.f32 %v4869_v13, %v910_v7  ;;  %v3465_v26 = vor.u32 %v4309_v2, %v3464_v58  ;;  %v4305_v13 = vld [vmem:[#allocation10 + $0x54] sm:$0xf0]  ;;  %v3849_v51 = vor.u32 %v4405_v43, %v3848_v14 }
 0x122   :  { %2722 = vmatpush.bf16.msra.mxu3 %v3897_v61  ;;  %v4932_v8 = vadd.f32 %v1049_v33, %v1021_v32  ;;  %v1250_v40 = vmax.f32 %v1248_v31, %v1249_v54  ;;  %v994_v41 = vadd.f32 %v993_v3, %v965_v55  ;;  %v883_v61 = vadd.f32 %v4873_v16, %v854_v18  ;;  %v3576_v33 = vld [vmem:[#allocation10 + $0x148] sm:$0xf]  ;;  %v4337_v37 = vld [vmem:[#allocation10 + $0x154] sm:$0xf0] }
 0x123   :  { %2684 = vmatpush.bf16.msra.mxu0 %v3497_v20  ;;  %v3593_v30 = vor.u32 %v4341_v21, %v3592_v42  ;;  %v3721_v32 = vor.u32 %v4373_v34, %v3720_v22  ;;  %v3704_v36 = vld [vmem:[#allocation10 + $0x248] sm:$0xf]  ;;  %v4369_v54 = vld [vmem:[#allocation10 + $0x254] sm:$0xf0]  ;;  %v3449_v15 = vor.u32 %v4305_v13, %v3448_v25 }
 0x124   :  { %2697 = vmatpush.bf16.msra.mxu1 %v3625_v45  ;;  %v1251_v11 = vrot.slane %v1250_v40, 1  ;;  %v1259_v12 = vrot.slane %v994_v41, 4  ;;  %v3832_v3 = vld [vmem:[#allocation10 + $0x348] sm:$0xf]  ;;  %v912_v6 = vadd.f32 %v4875_v48, %v883_v61  ;;  %v3705_v18 = vor.u32 %v4369_v54, %v3704_v36  ;;  %v4365_v42 = vld [vmem:[#allocation10 + $0x234] sm:$0xf0] }
 0x125   :  { %2710 = vmatpush.bf16.msra.mxu2 %v3753_v35  ;;  %v3688_v2 = vld [vmem:[#allocation10 + $0x228] sm:$0xf]  ;;  %v4397_v21 = vld [vmem:[#allocation10 + $0x334] sm:$0xf0] }
 0x126   :  { %2723 = vmatpush.bf16.msra.mxu3 %v3881_v50  ;;  %v1252_v57 = vmax.f32 %v1250_v40, %v1251_v11  ;;  %v1260_v24 = vmax.f32 %v994_v41, %v1259_v12  ;;  %v4401_v50 = vld [vmem:[#allocation10 + $0x354] sm:$0xf0]  ;;  %v3560_v41 = vld [vmem:[#allocation10 + $0x128] sm:$0xf]  ;;  %v941_v11 = vadd.f32 %v4879_v0, %v912_v6 }
 0x127   :  { %2685 = vmatpush.bf16.msra.mxu0 %v3481_v19  ;;  %v1022_v1 = vpop.f32.mrf.mxu2  ;;  %v967_v20 = vpop.f32.mrf.mxu0  ;;  %v4301_v40 = vld [vmem:[#allocation10 + $0x34] sm:$0xf0]  ;;  %v3816_v48 = vld [vmem:[#allocation10 + $0x328] sm:$0xf] }
 0x128   :  { %2698 = vmatpush.bf16.msra.mxu1 %v3609_v10  ;;  %v1023_v31 = vadd.f32 %v1022_v1, %v4892_v47  ;;  %v1051_v29 = vpop.f32.mrf.mxu3  ;;  %v1322_v45 = vsel %vm1321_vm3, %v1252_v57, %v1320_v53  ;;  %v1261_v16 = vrot.slane %v1260_v24, 2  ;;  %v968_v35 = vadd.f32 %v967_v20, %v939_v38  ;;  %v996_v46 = vpop.f32.mrf.mxu1  ;;  %v4333_v19 = vld [vmem:[#allocation10 + $0x134] sm:$0xf0]  ;;  %v3416_v38 = vld [vmem:[#allocation10 + $0x8] sm:$0xf] }
 0x129   :  { %2711 = vmatpush.bf16.msra.mxu2 %v3737_v56  ;;  %v3577_v53 = vor.u32 %v4337_v37, %v3576_v33  ;;  %v3833_v56 = vor.u32 %v4401_v50, %v3832_v3  ;;  %v3433_v34 = vor.u32 %v4301_v40, %v3432_v17  ;;  %v4297_v14 = vld [vmem:[#allocation10 + $0x14] sm:$0xf0]  ;;  %v3544_v43 = vld [vmem:[#allocation10 + $0x108] sm:$0xf]  ;;  %v3689_v1 = vor.u32 %v4365_v42, %v3688_v2  ;;  %v4323_v3 = vld [vmem:[#allocation10 + $0xec] sm:$0xf] }
 0x12a   :  { %2724 = vmatpush.bf16.msra.mxu3 %v3865_v60  ;;  %v4940_v55 = vadd.f32 %v1051_v29, %v1023_v31  ;;  %v1262_v62 = vmax.f32 %v1260_v24, %v1261_v16  ;;  %v997_v7 = vadd.f32 %v996_v46, %v968_v35  ;;  %v3561_v24 = vor.u32 %v4333_v19, %v3560_v41  ;;  %v3672_v25 = vld [vmem:[#allocation10 + $0x208] sm:$0xf]  ;;  %v4361_v31 = vld [vmem:[#allocation10 + $0x214] sm:$0xf0]  ;;  %v3530_v50 = vld [vmem:[#allocation10 + $0xf8] sm:$0xf0] }
 0x12b   :  { %2686 = vmatpush.bf16.msra.mxu0 %v3465_v26  ;;  %v4329_v26 = vld [vmem:[#allocation10 + $0x114] sm:$0xf0]  ;;  %v3800_v13 = vld [vmem:[#allocation10 + $0x308] sm:$0xf]  ;;  %v3417_v36 = vor.u32 %v4297_v14, %v3416_v38  ;;  %v3673_v6 = vor.u32 %v4361_v31, %v3672_v25  ;;  %v3533_v19 = vor.u32 %v4323_v3, %v3530_v50  ;;  %v4351_v38 = vld [vmem:[#allocation10 + $0x1cc] sm:$0xf] }
 0x12c   :  { %2699 = vmatpush.bf16.msra.mxu1 %v3593_v30  ;;  %v1263_v58 = vrot.slane %v1262_v62, 1  ;;  %v1271_v10 = vrot.slane %v997_v7, 4  ;;  %v4393_v33 = vld [vmem:[#allocation10 + $0x314] sm:$0xf0]  ;;  %v4040_v37 = vld [vmem:[#allocation10 + $0x4e8] sm:$0xf] }
 0x12d   :  { %2712 = vmatpush.bf16.msra.mxu2 %v3721_v32  ;;  %v3817_v32 = vor.u32 %v4397_v21, %v3816_v48  ;;  %v4453_v16 = vld [vmem:[#allocation10 + $0x4f4] sm:$0xf0]  ;;  %v4168_v35 = vld [vmem:[#allocation10 + $0x5e8] sm:$0xf]  ;;  %v3642_v14 = vld [vmem:[#allocation10 + $0x1d8] sm:$0xf0] }
 0x12e   :  { %2725 = vmatpush.bf16.msra.mxu3 %v3849_v51  ;;  %v1264_v12 = vmax.f32 %v1262_v62, %v1263_v58  ;;  %v1272_v60 = vmax.f32 %v997_v7, %v1271_v10  ;;  %v4485_v54 = vld [vmem:[#allocation10 + $0x5f4] sm:$0xf0]  ;;  %v4355_v62 = vld [vmem:[#allocation10 + $0x1ec] sm:$0xf]  ;;  %v3658_v7 = vld [vmem:[#allocation10 + $0x1f8] sm:$0xf0] }
 0x12f   :  { %2687 = vmatpush.bf16.msra.mxu0 %v3449_v15  ;;  %v4944_v22 = vpop.f32.mrf.mxu2  ;;  %v969_v57 = vpop.f32.mrf.mxu0  ;;  %v4024_v40 = vld [vmem:[#allocation10 + $0x4c8] sm:$0xf]  ;;  %v4169_v41 = vor.u32 %v4485_v54, %v4168_v35  ;;  %v4449_v58 = vld [vmem:[#allocation10 + $0x4d4] sm:$0xf0]  ;;  %v3661_v48 = vor.u32 %v4355_v62, %v3658_v7  ;;  %v1013_v35 = vadd.f32 %v4899_v52, %v4892_v47 }
 0x130   :  { %2700 = vmatpush.bf16.msra.mxu1 %v3577_v53  ;;  %v4946_v61 = vpop.f32.mrf.mxu3  ;;  %v1324_v0 = vsel %vm1323_vm4, %v1264_v12, %v1322_v45  ;;  %v1273_v29 = vrot.slane %v1272_v60, 2  ;;  %v970_v20 = vadd.f32 %v969_v57, %v941_v11  ;;  %v998_v30 = vpop.f32.mrf.mxu1  ;;  %v3545_v45 = vor.u32 %v4329_v26, %v3544_v43  ;;  %v4152_v10 = vld [vmem:[#allocation10 + $0x5c8] sm:$0xf]  ;;  %v4319_v11 = vld [vmem:[#allocation10 + $0xcc] sm:$0xf] }
 0x131   :  { %2713 = vmatpush.bf16.msra.mxu2 %v3705_v18  ;;  %v3801_v53 = vor.u32 %v4393_v33, %v3800_v13  ;;  %v4041_v18 = vor.u32 %v4453_v16, %v4040_v37  ;;  %v3514_v12 = vld [vmem:[#allocation10 + $0xd8] sm:$0xf0]  ;;  %v4008_v25 = vld [vmem:[#allocation10 + $0x4a8] sm:$0xf]  ;;  %v4445_v31 = vld [vmem:[#allocation10 + $0x4b4] sm:$0xf0]  ;;  %v3645_v13 = vor.u32 %v4351_v38, %v3642_v14 }
 0x132   :  { %2726 = vmatpush.bf16.msra.mxu3 %v3833_v56  ;;  %v1274_v46 = vmax.f32 %v1272_v60, %v1273_v29  ;;  %v999_v51 = vadd.f32 %v998_v30, %v970_v20  ;;  %v4481_v56 = vld [vmem:[#allocation10 + $0x5d4] sm:$0xf0]  ;;  %v3517_v26 = vor.u32 %v4319_v11, %v3514_v12  ;;  %v4136_v29 = vld [vmem:[#allocation10 + $0x5a8] sm:$0xf]  ;;  %v4315_v37 = vld [vmem:[#allocation10 + $0xac] sm:$0xf] }
 0x133   :  { %2688 = vmatpush.bf16.msra.mxu0 %v3433_v34  ;;  %v4477_v33 = vld [vmem:[#allocation10 + $0x5b4] sm:$0xf0]  ;;  %v3498_v16 = vld [vmem:[#allocation10 + $0xb8] sm:$0xf0]  ;;  %v3992_v54 = vld [vmem:[#allocation10 + $0x488] sm:$0xf] }
 0x134   :  { %2701 = vmatpush.bf16.msra.mxu1 %v3561_v24  ;;  %v1275_v15 = vrot.slane %v1274_v46, 1  ;;  %v1283_v17 = vrot.slane %v999_v51, 4  ;;  %v4025_v24 = vor.u32 %v4449_v58, %v4024_v40  ;;  %v3501_v3 = vor.u32 %v4315_v37, %v3498_v16  ;;  %v4441_v50 = vld [vmem:[#allocation10 + $0x494] sm:$0xf0]  ;;  %v3610_v58 = vld [vmem:[#allocation10 + $0x198] sm:$0xf0] }
 0x135   :  { %2714 = vmatpush.bf16.msra.mxu2 %v3689_v1  ;;  %v4153_v1 = vor.u32 %v4481_v56, %v4152_v10  ;;  %v4437_v38 = vld [vmem:[#allocation10 + $0x474] sm:$0xf0]  ;;  %v4104_v14 = vld [vmem:[#allocation10 + $0x568] sm:$0xf] }
 0x136   :  { %2727 = vmatpush.bf16.msra.mxu3 %v3817_v32  ;;  %v1276_v2 = vmax.f32 %v1274_v46, %v1275_v15  ;;  %v1284_v42 = vmax.f32 %v999_v51, %v1283_v17  ;;  %v4347_v46 = vld [vmem:[#allocation10 + $0x1ac] sm:$0xf]  ;;  %v3626_v51 = vld [vmem:[#allocation10 + $0x1b8] sm:$0xf0]  ;;  %v4473_v15 = vld [vmem:[#allocation10 + $0x594] sm:$0xf0] }
 0x137   :  { %2689 = vmatpush.bf16.msra.mxu0 %v3417_v36  ;;  %v4949_v21 = vpop.f32.mrf.mxu2  ;;  %v1068_v34 = vpop.f32.mrf.mxu0  ;;  %v4009_v36 = vor.u32 %v4445_v31, %v4008_v25  ;;  %v3629_v62 = vor.u32 %v4347_v46, %v3626_v51  ;;  %v4311_v17 = vld [vmem:[#allocation10 + $0x8c] sm:$0xf]  ;;  %v4465_v37 = vld [vmem:[#allocation10 + $0x554] sm:$0xf0]  ;;  %v3450_v51 = vld [vmem:[#allocation10 + $0x58] sm:$0xf0] }
 0x138   :  { %2702 = vmatpush.bf16.msra.mxu1 %v3545_v45  ;;  %v4951_v60 = vpop.f32.mrf.mxu3  ;;  %v1285_v43 = vrot.slane %v1284_v42, 2  ;;  %v1097_v57 = vpop.f32.mrf.mxu1  ;;  %v1326_v20 = vsel %vm1325_vm5, %v1276_v2, %v1324_v0  ;;  %v1069_v32 = vadd.f32 %v1068_v34, %v4897_v59  ;;  %v4137_v59 = vor.u32 %v4477_v33, %v4136_v29  ;;  %v4120_v45 = vld [vmem:[#allocation10 + $0x588] sm:$0xf]  ;;  %v4303_v46 = vld [vmem:[#allocation10 + $0x4c] sm:$0xf] }
 0x139   :  { %2715 = vmatpush.bf16.msra.mxu2 %v3673_v6  ;;  %v3993_v2 = vor.u32 %v4441_v50, %v3992_v54  ;;  %v4121_v11 = vor.u32 %v4473_v15, %v4120_v45  ;;  %v3976_v34 = vld [vmem:[#allocation10 + $0x468] sm:$0xf] }
 0x13a   :  { %2728 = vmatpush.bf16.msra.mxu3 %v3801_v53  ;;  %v1286_v30 = vmax.f32 %v1284_v42, %v1285_v43  ;;  %2690 = vmatmul.bf16.vlgmr.msra.gmra.mxu0 %v4877_v49  ;;  %v1098_v6 = vadd.f32 %v1097_v57, %v1069_v32  ;;  %v3482_v53 = vld [vmem:[#allocation10 + $0x98] sm:$0xf0]  ;;  %v4469_v43 = vld [vmem:[#allocation10 + $0x574] sm:$0xf0]  ;;  %v4307_v57 = vld [vmem:[#allocation10 + $0x6c] sm:$0xf]  ;;  %v3977_v31 = vor.u32 %v4437_v38, %v3976_v34 }
 0x13b   :  { %2734 = vmatpush.bf16.msrb.mxu0 %v4041_v18  ;;  %2703 = vmatmul.bf16.vlgmr.msra.gmra.mxu1 %v4881_v27  ;;  %v1042_v18 = vadd.f32 %v4903_v39, %v1013_v35  ;;  %v3485_v12 = vor.u32 %v4311_v17, %v3482_v53  ;;  %v3960_v29 = vld [vmem:[#allocation10 + $0x448] sm:$0xf]  ;;  %v3453_v17 = vor.u32 %v4303_v46, %v3450_v51  ;;  %v4429_v53 = vld [vmem:[#allocation10 + $0x434] sm:$0xf0] }
 0x13c   :  { %2747 = vmatpush.bf16.msrb.mxu1 %v4169_v41  ;;  %2716 = vmatmul.bf16.vlgmr.msra.gmra.mxu2 %v4883_v23  ;;  %v1287_v0 = vrot.slane %v1286_v30, 1  ;;  %v4088_v33 = vld [vmem:[#allocation10 + $0x548] sm:$0xf] }
 0x13d   :  { %2760 = vmatpush.bf16.msrb.mxu2 %v3533_v19  ;;  %2729 = vmatmul.bf16.vlgmr.msra.gmra.mxu3 %v4886_v28  ;;  %v4343_v19 = vld [vmem:[#allocation10 + $0x18c] sm:$0xf]  ;;  %v4056_v38 = vld [vmem:[#allocation10 + $0x508] sm:$0xf] }
 0x13e   :  { %2773 = vmatpush.bf16.msrb.mxu3 %v3661_v48  ;;  %v1288_v52 = vmax.f32 %v1286_v30, %v1287_v0  ;;  %v3613_v39 = vor.u32 %v4343_v19, %v3610_v58  ;;  %v4105_v30 = vor.u32 %v4469_v43, %v4104_v14  ;;  %v4299_v19 = vld [vmem:[#allocation10 + $0x2c] sm:$0xf]  ;;  %v3434_v58 = vld [vmem:[#allocation10 + $0x38] sm:$0xf0]  ;;  %v4457_v14 = vld [vmem:[#allocation10 + $0x514] sm:$0xf0] }
 0x13f   :  { %2735 = vmatpush.bf16.msrb.mxu0 %v4025_v24  ;;  %v1126_v7 = vpop.f32.mrf.mxu2  ;;  %v1070_v41 = vpop.f32.mrf.mxu0  ;;  %v3466_v24 = vld [vmem:[#allocation10 + $0x78] sm:$0xf0] }
 0x140   :  { %2748 = vmatpush.bf16.msrb.mxu1 %v4153_v1  ;;  %v1155_v40 = vpop.f32.mrf.mxu3  ;;  %v1127_v10 = vadd.f32 %v1126_v7, %v1098_v6  ;;  %v1099_v56 = vpop.f32.mrf.mxu1  ;;  %v1328_v42 = vsel %vm1327_vm6, %v1288_v52, %v1326_v20  ;;  %v1071_v48 = vadd.f32 %v1070_v41, %v1042_v18  ;;  %v4339_v1 = vld [vmem:[#allocation10 + $0x16c] sm:$0xf]  ;;  %v3469_v32 = vor.u32 %v4307_v57, %v3466_v24  ;;  %v4072_v18 = vld [vmem:[#allocation10 + $0x528] sm:$0xf] }
 0x141   :  { %2761 = vmatpush.bf16.msrb.mxu2 %v3517_v26  ;;  %v3594_v26 = vld [vmem:[#allocation10 + $0x178] sm:$0xf0]  ;;  %1338 = vst [vmem:[#allocation11] sm:$0xff] %v1328_v42  ;;  %v4089_v6 = vor.u32 %v4465_v37, %v4088_v33  ;;  %v3437_v57 = vor.u32 %v4299_v19, %v3434_v58  ;;  %v4295_v24 = vld [vmem:[#allocation10 + $0xc] sm:$0xf] }
 0x142   :  { %2774 = vmatpush.bf16.msrb.mxu3 %v3645_v13  ;;  %v1156_v25 = vadd.f32 %v1155_v40, %v1127_v10  ;;  %v1100_v20 = vadd.f32 %v1099_v56, %v1071_v48  ;;  %v4433_v13 = vld [vmem:[#allocation10 + $0x454] sm:$0xf0]  ;;  %v3597_v16 = vor.u32 %v4339_v1, %v3594_v26  ;;  %v4331_v10 = vld [vmem:[#allocation10 + $0x12c] sm:$0xf]  ;;  %v1018_v56 = vadd.f32 %v4917_v44, %v4892_v47  ;;  %v3562_v42 = vld [vmem:[#allocation10 + $0x138] sm:$0xf0] }
 0x143   :  { %2736 = vmatpush.bf16.msrb.mxu0 %v4009_v36  ;;  %v3961_v52 = vor.u32 %v4433_v13, %v3960_v29  ;;  %v4461_v40 = vld [vmem:[#allocation10 + $0x534] sm:$0xf0]  ;;  %v3928_v48 = vld [vmem:[#allocation10 + $0x408] sm:$0xf]  ;;  %v3418_v1 = vld [vmem:[#allocation10 + $0x18] sm:$0xf0]  ;;  %v3565_v44 = vor.u32 %v4331_v10, %v3562_v42 }
 0x144   :  { %2749 = vmatpush.bf16.msrb.mxu1 %v4137_v59  ;;  %v4335_v59 = vld [vmem:[#allocation10 + $0x14c] sm:$0xf]  ;;  %v1205_v50 = vrot.slane %v1156_v25, 4  ;;  %v4073_v34 = vor.u32 %v4461_v40, %v4072_v18  ;;  %v3546_v29 = vld [vmem:[#allocation10 + $0x118] sm:$0xf0] }
 0x145   :  { %2762 = vmatpush.bf16.msrb.mxu2 %v3501_v3  ;;  %v3578_v3 = vld [vmem:[#allocation10 + $0x158] sm:$0xf0]  ;;  %v4327_v26 = vld [vmem:[#allocation10 + $0x10c] sm:$0xf] }
 0x146   :  { %2775 = vmatpush.bf16.msrb.mxu3 %v3629_v62  ;;  %v3944_v62 = vld [vmem:[#allocation10 + $0x428] sm:$0xf]  ;;  %v3581_v41 = vor.u32 %v4335_v59, %v3578_v3  ;;  %v4042_v59 = vld [vmem:[#allocation10 + $0x4f8] sm:$0xf0] }
 0x147   :  { %2737 = vmatpush.bf16.msrb.mxu0 %v3993_v2  ;;  %v1128_v35 = vpop.f32.mrf.mxu2  ;;  %v1073_v54 = vpop.f32.mrf.mxu0  ;;  %v3770_v40 = vld [vmem:[#allocation10 + $0x2d8] sm:$0xf0] }
 0x148   :  { %2750 = vmatpush.bf16.msrb.mxu1 %v4121_v11  ;;  %v1129_v0 = vadd.f32 %v1128_v35, %v1100_v20  ;;  %v1157_v36 = vpop.f32.mrf.mxu3  ;;  %v1102_v45 = vpop.f32.mrf.mxu1  ;;  %v1074_v15 = vadd.f32 %v1073_v54, %v4915_v9  ;;  %v1206_v11 = vmax.f32 %v1156_v25, %v1205_v50  ;;  %v4425_v9 = vld [vmem:[#allocation10 + $0x414] sm:$0xf0]  ;;  %v4387_v20 = vld [vmem:[#allocation10 + $0x2ec] sm:$0xf]  ;;  %v3786_v25 = vld [vmem:[#allocation10 + $0x2f8] sm:$0xf0] }
 0x149   :  { %2763 = vmatpush.bf16.msrb.mxu2 %v3485_v12  ;;  %v3945_v12 = vor.u32 %v4429_v53, %v3944_v62  ;;  %v3914_v35 = vld [vmem:[#allocation10 + $0x3f8] sm:$0xf0]  ;;  %v4451_v54 = vld [vmem:[#allocation10 + $0x4ec] sm:$0xf]  ;;  %v3549_v62 = vor.u32 %v4327_v26, %v3546_v29 }
 0x14a   :  { %2776 = vmatpush.bf16.msrb.mxu3 %v3613_v39  ;;  %v1158_v7 = vadd.f32 %v1157_v36, %v1129_v0  ;;  %v1103_v43 = vadd.f32 %v1102_v45, %v1074_v15  ;;  %v1207_v46 = vrot.slane %v1206_v11, 2  ;;  %v3929_v0 = vor.u32 %v4425_v9, %v3928_v48  ;;  %v4383_v15 = vld [vmem:[#allocation10 + $0x2cc] sm:$0xf]  ;;  %v3898_v10 = vld [vmem:[#allocation10 + $0x3d8] sm:$0xf0] }
 0x14b   :  { %2738 = vmatpush.bf16.msrb.mxu0 %v3977_v31  ;;  %v4057_v36 = vor.u32 %v4457_v14, %v4056_v38  ;;  %v3421_v45 = vor.u32 %v4295_v24, %v3418_v1  ;;  %v4045_v18 = vor.u32 %v4451_v54, %v4042_v59  ;;  %v3773_v14 = vor.u32 %v4383_v15, %v3770_v40  ;;  %v3882_v29 = vld [vmem:[#allocation10 + $0x3b8] sm:$0xf0] }
 0x14c   :  { %2751 = vmatpush.bf16.msrb.mxu1 %v4105_v30  ;;  %v1217_v2 = vrot.slane %v1158_v7, 4  ;;  %v1047_v30 = vadd.f32 %v4919_v63, %v1018_v56  ;;  %v4170_v63 = vld [vmem:[#allocation10 + $0x5f8] sm:$0xf0]  ;;  %v1208_v19 = vmax.f32 %v1206_v11, %v1207_v46  ;;  %v4447_v56 = vld [vmem:[#allocation10 + $0x4cc] sm:$0xf] }
 0x14d   :  { %2764 = vmatpush.bf16.msrb.mxu2 %v3469_v32  ;;  %v4138_v46 = vld [vmem:[#allocation10 + $0x5b8] sm:$0xf0] }
 0x14e   :  { %2777 = vmatpush.bf16.msrb.mxu3 %v3597_v16  ;;  %v1218_v39 = vmax.f32 %v1158_v7, %v1217_v2  ;;  %v4419_v16 = vld [vmem:[#allocation10 + $0x3ec] sm:$0xf]  ;;  %v3789_v7 = vor.u32 %v4387_v20, %v3786_v25  ;;  %v4026_v2 = vld [vmem:[#allocation10 + $0x4d8] sm:$0xf0]  ;;  %v1209_v20 = vrot.slane %v1208_v19, 1 }
 0x14f   :  { %2739 = vmatpush.bf16.msrb.mxu0 %v3961_v52  ;;  %v1131_v31 = vpop.f32.mrf.mxu2  ;;  %v1075_v37 = vpop.f32.mrf.mxu0  ;;  %v4483_v52 = vld [vmem:[#allocation10 + $0x5ec] sm:$0xf]  ;;  %v3917_v53 = vor.u32 %v4419_v16, %v3914_v35  ;;  %v4029_v26 = vor.u32 %v4447_v56, %v4026_v2  ;;  %v3738_v54 = vld [vmem:[#allocation10 + $0x298] sm:$0xf0] }
 0x150   :  { %2752 = vmatpush.bf16.msrb.mxu1 %v4089_v6  ;;  %v1219_v32 = vrot.slane %v1218_v39, 2  ;;  %v1132_v13 = vadd.f32 %v1131_v31, %v1103_v43  ;;  %v1160_v33 = vpop.f32.mrf.mxu3  ;;  %v1104_v51 = vpop.f32.mrf.mxu1  ;;  %v1076_v50 = vadd.f32 %v1075_v37, %v1047_v30  ;;  %v4173_v58 = vor.u32 %v4483_v52, %v4170_v63  ;;  %v3754_v43 = vld [vmem:[#allocation10 + $0x2b8] sm:$0xf0]  ;;  %v4411_v31 = vld [vmem:[#allocation10 + $0x3ac] sm:$0xf] }
 0x151   :  { %2765 = vmatpush.bf16.msrb.mxu2 %v3453_v17  ;;  %v4475_v35 = vld [vmem:[#allocation10 + $0x5ac] sm:$0xf]  ;;  %v3866_v52 = vld [vmem:[#allocation10 + $0x398] sm:$0xf0] }
 0x152   :  { %2778 = vmatpush.bf16.msrb.mxu3 %v3581_v41  ;;  %v1161_v3 = vadd.f32 %v1160_v33, %v1132_v13  ;;  %v1220_v6 = vmax.f32 %v1218_v39, %v1219_v32  ;;  %v4415_v41 = vld [vmem:[#allocation10 + $0x3cc] sm:$0xf]  ;;  %v1105_v48 = vadd.f32 %v1104_v51, %v1076_v50  ;;  %v4010_v13 = vld [vmem:[#allocation10 + $0x4b8] sm:$0xf0]  ;;  %v3885_v50 = vor.u32 %v4411_v31, %v3882_v29 }
 0x153   :  { %2740 = vmatpush.bf16.msrb.mxu0 %v3945_v12  ;;  %v4479_v12 = vld [vmem:[#allocation10 + $0x5cc] sm:$0xf]  ;;  %v3901_v1 = vor.u32 %v4415_v41, %v3898_v10 }
 0x154   :  { %2753 = vmatpush.bf16.msrb.mxu1 %v4073_v34  ;;  %v1229_v17 = vrot.slane %v1161_v3, 4  ;;  %v4154_v34 = vld [vmem:[#allocation10 + $0x5d8] sm:$0xf0]  ;;  %v1221_v9 = vrot.slane %v1220_v6, 1  ;;  %v4379_v39 = vld [vmem:[#allocation10 + $0x2ac] sm:$0xf] }
 0x155   :  { %2766 = vmatpush.bf16.msrb.mxu2 %v3437_v57  ;;  %v4157_v25 = vor.u32 %v4479_v12, %v4154_v34  ;;  %v4443_v32 = vld [vmem:[#allocation10 + $0x4ac] sm:$0xf]  ;;  %v3722_v34 = vld [vmem:[#allocation10 + $0x278] sm:$0xf0] }
 0x156   :  { %2779 = vmatpush.bf16.msrb.mxu3 %v3565_v44  ;;  %v1230_v42 = vmax.f32 %v1161_v3, %v1229_v17  ;;  %v1222_v51 = vmax.f32 %v1220_v6, %v1221_v9  ;;  %v4439_v63 = vld [vmem:[#allocation10 + $0x48c] sm:$0xf] }
 0x157   :  { %2741 = vmatpush.bf16.msrb.mxu0 %v3929_v0  ;;  %v1133_v38 = vpop.f32.mrf.mxu2  ;;  %v1078_v44 = vpop.f32.mrf.mxu0  ;;  %v3757_v0 = vor.u32 %v4379_v39, %v3754_v43  ;;  %v4471_v17 = vld [vmem:[#allocation10 + $0x58c] sm:$0xf]  ;;  %v3850_v39 = vld [vmem:[#allocation10 + $0x378] sm:$0xf0] }
 0x158   :  { %2754 = vmatpush.bf16.msrb.mxu1 %v4057_v36  ;;  %v1231_v57 = vrot.slane %v1230_v42, 2  ;;  %v1134_v11 = vadd.f32 %v1133_v38, %v1105_v48  ;;  %v1162_v24 = vpop.f32.mrf.mxu3  ;;  %v1107_v30 = vpop.f32.mrf.mxu1  ;;  %v1079_v16 = vadd.f32 %v1078_v44, %v4932_v8  ;;  %v4375_v36 = vld [vmem:[#allocation10 + $0x28c] sm:$0xf]  ;;  %v1026_v44 = vadd.f32 %v4944_v22, %v4892_v47  ;;  %v4090_v22 = vld [vmem:[#allocation10 + $0x558] sm:$0xf0] }
 0x159   :  { %2767 = vmatpush.bf16.msrb.mxu2 %v3421_v45  ;;  %v4013_v45 = vor.u32 %v4443_v32, %v4010_v13  ;;  %v4407_v8 = vld [vmem:[#allocation10 + $0x38c] sm:$0xf]  ;;  %v3741_v41 = vor.u32 %v4375_v36, %v3738_v54  ;;  %v3706_v13 = vld [vmem:[#allocation10 + $0x258] sm:$0xf0] }
 0x15a   :  { %2780 = vmatpush.bf16.msrb.mxu3 %v3549_v62  ;;  %2742 = vmatmul.bf16.vlgmr.msrb.gmra.mxu0 %v4901_v5  ;;  %v1232_v33 = vmax.f32 %v1230_v42, %v1231_v57  ;;  %v1163_v37 = vadd.f32 %v1162_v24, %v1134_v11  ;;  %v3994_v62 = vld [vmem:[#allocation10 + $0x498] sm:$0xf0]  ;;  %v1108_v15 = vadd.f32 %v1107_v30, %v1079_v16  ;;  %v4371_v10 = vld [vmem:[#allocation10 + $0x26c] sm:$0xf] }
 0x15b   :  { %2786 = vmatpush.bf16.msra.mxu0 %v3789_v7  ;;  %2755 = vmatmul.bf16.vlgmr.msrb.gmra.mxu1 %v4905_v4  ;;  %v3997_v48 = vor.u32 %v4439_v63, %v3994_v62  ;;  %v4403_v9 = vld [vmem:[#allocation10 + $0x36c] sm:$0xf]  ;;  %v3978_v57 = vld [vmem:[#allocation10 + $0x478] sm:$0xf0]  ;;  %v3725_v29 = vor.u32 %v4371_v10, %v3722_v34  ;;  %v1055_v36 = vadd.f32 %v4946_v61, %v1026_v44 }
 0x15c   :  { %2799 = vmatpush.bf16.msra.mxu1 %v3917_v53  ;;  %2768 = vmatmul.bf16.vlgmr.msrb.gmra.mxu2 %v4877_v49  ;;  %v1233_v59 = vrot.slane %v1232_v33, 1  ;;  %v1241_v3 = vrot.slane %v1163_v37, 4  ;;  %v1210_v49 = vmax.f32 %v1208_v19, %v1209_v20  ;;  %v4122_v53 = vld [vmem:[#allocation10 + $0x598] sm:$0xf0]  ;;  %v4435_v43 = vld [vmem:[#allocation10 + $0x46c] sm:$0xf]  ;;  %v3853_v30 = vor.u32 %v4403_v9, %v3850_v39 }
 0x15d   :  { %2812 = vmatpush.bf16.msra.mxu2 %v4045_v18  ;;  %2781 = vmatmul.bf16.vlgmr.msrb.gmra.mxu3 %v4881_v27  ;;  %v4141_v27 = vor.u32 %v4475_v35, %v4138_v46  ;;  %v4125_v38 = vor.u32 %v4471_v17, %v4122_v53  ;;  %v4367_v20 = vld [vmem:[#allocation10 + $0x24c] sm:$0xf]  ;;  %v3981_v32 = vor.u32 %v4435_v43, %v3978_v57  ;;  %v3834_v16 = vld [vmem:[#allocation10 + $0x358] sm:$0xf0] }
 0x15e   :  { %2825 = vmatpush.bf16.msra.mxu3 %v4173_v58  ;;  %v1234_v6 = vmax.f32 %v1232_v33, %v1233_v59  ;;  %v1242_v7 = vmax.f32 %v1163_v37, %v1241_v3  ;;  %v1329_v18 = vsel %vm1315_vm0, %v1222_v51, %v1210_v49  ;;  %v3869_v58 = vor.u32 %v4407_v8, %v3866_v52  ;;  %v4399_v33 = vld [vmem:[#allocation10 + $0x34c] sm:$0xf]  ;;  %v3962_v35 = vld [vmem:[#allocation10 + $0x458] sm:$0xf0] }
 0x15f   :  { %2787 = vmatpush.bf16.msra.mxu0 %v3773_v14  ;;  %v1136_v40 = vpop.f32.mrf.mxu2  ;;  %v1080_v12 = vpop.f32.mrf.mxu0  ;;  %v3709_v3 = vor.u32 %v4367_v20, %v3706_v13  ;;  %v3837_v49 = vor.u32 %v4399_v33, %v3834_v16  ;;  %v3690_v62 = vld [vmem:[#allocation10 + $0x238] sm:$0xf0]  ;;  %v4427_v61 = vld [vmem:[#allocation10 + $0x42c] sm:$0xf] }
 0x160   :  { %2800 = vmatpush.bf16.msra.mxu1 %v3901_v1  ;;  %v4974_v56 = vsel %vm1317_vm1, %v1234_v6, %v1329_v18  ;;  %v1243_v19 = vrot.slane %v1242_v7, 2  ;;  %v1137_v2 = vadd.f32 %v1136_v40, %v1108_v15  ;;  %v1165_v42 = vpop.f32.mrf.mxu3  ;;  %v1109_v14 = vpop.f32.mrf.mxu1  ;;  %v1081_v24 = vadd.f32 %v1080_v12, %v4940_v55  ;;  %v4467_v1 = vld [vmem:[#allocation10 + $0x56c] sm:$0xf]  ;;  %v3818_v17 = vld [vmem:[#allocation10 + $0x338] sm:$0xf0] }
 0x161   :  { %2813 = vmatpush.bf16.msra.mxu2 %v4029_v26  ;;  %v4106_v26 = vld [vmem:[#allocation10 + $0x578] sm:$0xf0]  ;;  %v4431_v55 = vld [vmem:[#allocation10 + $0x44c] sm:$0xf] }
 0x162   :  { %2826 = vmatpush.bf16.msra.mxu3 %v4157_v25  ;;  %v1166_v11 = vadd.f32 %v1165_v42, %v1137_v2  ;;  %v1244_v31 = vmax.f32 %v1242_v7, %v1243_v19  ;;  %v4109_v37 = vor.u32 %v4467_v1, %v4106_v26  ;;  %v1110_v51 = vadd.f32 %v1109_v14, %v1081_v24  ;;  %v4395_v6 = vld [vmem:[#allocation10 + $0x32c] sm:$0xf]  ;;  %v3946_v53 = vld [vmem:[#allocation10 + $0x438] sm:$0xf0] }
 0x163   :  { %2788 = vmatpush.bf16.msra.mxu0 %v3757_v0  ;;  %v4463_v0 = vld [vmem:[#allocation10 + $0x54c] sm:$0xf]  ;;  %v4074_v10 = vld [vmem:[#allocation10 + $0x538] sm:$0xf0]  ;;  %v1028_v19 = vadd.f32 %v4949_v21, %v4892_v47  ;;  %v3949_v14 = vor.u32 %v4427_v61, %v3946_v53 }
 0x164   :  { %2801 = vmatpush.bf16.msra.mxu1 %v3885_v50  ;;  %v1253_v25 = vrot.slane %v1166_v11, 4  ;;  %v1245_v54 = vrot.slane %v1244_v31, 1  ;;  %v4363_v50 = vld [vmem:[#allocation10 + $0x22c] sm:$0xf]  ;;  %v4093_v7 = vor.u32 %v4463_v0, %v4090_v22  ;;  %v3674_v12 = vld [vmem:[#allocation10 + $0x218] sm:$0xf0] }
 0x165   :  { %2814 = vmatpush.bf16.msra.mxu2 %v4013_v45  ;;  %v3693_v42 = vor.u32 %v4363_v50, %v3690_v62  ;;  %v4391_v39 = vld [vmem:[#allocation10 + $0x30c] sm:$0xf]  ;;  %v3802_v43 = vld [vmem:[#allocation10 + $0x318] sm:$0xf0] }
 0x166   :  { %2827 = vmatpush.bf16.msra.mxu3 %v4141_v27  ;;  %v1254_v46 = vmax.f32 %v1166_v11, %v1253_v25  ;;  %v3965_v27 = vor.u32 %v4431_v55, %v3962_v35  ;;  %v1246_v2 = vmax.f32 %v1244_v31, %v1245_v54  ;;  %v4423_v11 = vld [vmem:[#allocation10 + $0x40c] sm:$0xf]  ;;  %v3930_v24 = vld [vmem:[#allocation10 + $0x418] sm:$0xf0]  ;;  %v1057_v31 = vadd.f32 %v4951_v60, %v1028_v19 }
 0x167   :  { %2789 = vmatpush.bf16.msra.mxu0 %v3741_v41  ;;  %v1138_v59 = vpop.f32.mrf.mxu2  ;;  %v1083_v63 = vpop.f32.mrf.mxu0  ;;  %v4455_v21 = vld [vmem:[#allocation10 + $0x50c] sm:$0xf]  ;;  %v4058_v44 = vld [vmem:[#allocation10 + $0x518] sm:$0xf0]  ;;  %v3933_v16 = vor.u32 %v4423_v11, %v3930_v24 }
 0x168   :  { %2802 = vmatpush.bf16.msra.mxu1 %v3869_v58  ;;  %v1255_v45 = vrot.slane %v1254_v46, 2  ;;  %v1139_v8 = vadd.f32 %v1138_v59, %v1110_v51  ;;  %v1167_v52 = vpop.f32.mrf.mxu3  ;;  %v1112_v15 = vpop.f32.mrf.mxu1  ;;  %v1084_v41 = vadd.f32 %v1083_v63, %v1055_v36  ;;  %v4459_v58 = vld [vmem:[#allocation10 + $0x52c] sm:$0xf]  ;;  %v4061_v35 = vor.u32 %v4455_v21, %v4058_v44  ;;  %v4989_v36 = vld [vmem:[%s5013_s5] sm:$0xf]  ;;  %s4688_s5 = smov [#allocation11]  }
 0x169   :  { %2815 = vmatpush.bf16.msra.mxu2 %v3997_v48  ;;  %v4359_v48 = vld [vmem:[#allocation10 + $0x20c] sm:$0xf]  ;;  %v4077_v57 = vor.u32 %v4459_v58, %v4074_v10  ;;  %s2896_s29 = sshll.u32 %s4688_s5, 4  ;;  %v1538_v11 = vperm.slane %v4989_v36, 1  ;;  %s2897_s29 = int_to_ptr.vmem [resolvable:$true] %s2896_s29 }
 0x16a   :  { %2828 = vmatpush.bf16.msra.mxu3 %v4125_v38  ;;  %v1256_v18 = vmax.f32 %v1254_v46, %v1255_v45  ;;  %v1168_v40 = vadd.f32 %v1167_v52, %v1139_v8  ;;  %v3821_v38 = vor.u32 %v4395_v6, %v3818_v17  ;;  %v1113_v47 = vadd.f32 %v1112_v15, %v1084_v41 }
 0x16b   :  { %2790 = vmatpush.bf16.msra.mxu0 %v3725_v29  ;;  %v1331_v29 = vsel %vm1319_vm2, %v1246_v2, %v4974_v56  ;;  %v3677_v25 = vor.u32 %v4359_v48, %v3674_v12  ;;  %v1537_v45 = vperm.slane %v4989_v36, 0 }
 0x16c   :  { %2803 = vmatpush.bf16.msra.mxu1 %v3853_v30  ;;  %v1257_v34 = vrot.slane %v1256_v18, 1  ;;  %v1265_v9 = vrot.slane %v1168_v40, 4  ;;  %v3805_v30 = vor.u32 %v4391_v39, %v3802_v43 }
 0x16d   :  { %2816 = vmatpush.bf16.msra.mxu2 %v3981_v32 }
 0x16e   :  { %2829 = vmatpush.bf16.msra.mxu3 %v4109_v37  ;;  %v1258_v1 = vmax.f32 %v1256_v18, %v1257_v34  ;;  %v1266_v26 = vmax.f32 %v1168_v40, %v1265_v9 }
 0x16f   :  { %2791 = vmatpush.bf16.msra.mxu0 %v3709_v3  ;;  %v1141_v20 = vpop.f32.mrf.mxu2  ;;  %v1085_v55 = vpop.f32.mrf.mxu0 }
 0x170   :  { %2804 = vmatpush.bf16.msra.mxu1 %v3837_v49  ;;  %v1332_v32 = vsel %vm1321_vm3, %v1258_v1, %v1331_v29  ;;  %v1267_v13 = vrot.slane %v1266_v26, 2  ;;  %v1142_v33 = vadd.f32 %v1141_v20, %v1113_v47  ;;  %v1170_v37 = vpop.f32.mrf.mxu3  ;;  %v1114_v46 = vpop.f32.mrf.mxu1  ;;  %v1086_v0 = vadd.f32 %v1085_v55, %v1057_v31 }
 0x171   :  { %2817 = vmatpush.bf16.msra.mxu2 %v3965_v27 }
 0x172   :  { %2830 = vmatpush.bf16.msra.mxu3 %v4093_v7  ;;  %v1268_v60 = vmax.f32 %v1266_v26, %v1267_v13  ;;  %v1171_v51 = vadd.f32 %v1170_v37, %v1142_v33  ;;  %v1115_v3 = vadd.f32 %v1114_v46, %v1086_v0 }
 0x173   :  { %2792 = vmatpush.bf16.msra.mxu0 %v3693_v42 }
 0x174   :  { %2805 = vmatpush.bf16.msra.mxu1 %v3821_v38  ;;  %v1269_v56 = vrot.slane %v1268_v60, 1  ;;  %v1277_v22 = vrot.slane %v1171_v51, 4 }
 0x175   :  { %2818 = vmatpush.bf16.msra.mxu2 %v3949_v14 }
 0x176   :  { %2831 = vmatpush.bf16.msra.mxu3 %v4077_v57  ;;  %v1270_v54 = vmax.f32 %v1268_v60, %v1269_v56  ;;  %v1278_v59 = vmax.f32 %v1171_v51, %v1277_v22 }
 0x177   :  { %2793 = vmatpush.bf16.msra.mxu0 %v3677_v25  ;;  %v1143_v50 = vpop.f32.mrf.mxu2  ;;  %v2535_v63 = vpop.f32.mrf.mxu0 }
 0x178   :  { %2806 = vmatpush.bf16.msra.mxu1 %v3805_v30  ;;  %v1333_v8 = vsel %vm1323_vm4, %v1270_v54, %v1332_v32  ;;  %v1279_v52 = vrot.slane %v1278_v59, 2  ;;  %v1144_v49 = vadd.f32 %v1143_v50, %v1115_v3  ;;  %v1172_v27 = vpop.f32.mrf.mxu3  ;;  %v2548_v62 = vpop.f32.mrf.mxu1  ;;  %v2536_v15 = vadd.f32 %v2535_v63, %v1537_v45 }
 0x179   :  { %2819 = vmatpush.bf16.msra.mxu2 %v3933_v16 }
 0x17a   :  { %2832 = vmatpush.bf16.msra.mxu3 %v4061_v35  ;;  %2794 = vmatmul.bf16.vlgmr.msra.gmra.mxu0 %v4883_v23  ;;  %v1280_v6 = vmax.f32 %v1278_v59, %v1279_v52  ;;  %v1173_v7 = vadd.f32 %v1172_v27, %v1144_v49  ;;  %v1539_v59 = vperm.slane %v4989_v36, 2 }
 0x17b   :  { %2807 = vmatmul.bf16.vlgmr.msra.gmra.mxu1 %v4886_v28 }
 0x17c   :  { %2820 = vmatmul.bf16.vlgmr.msra.gmra.mxu2 %v4901_v5  ;;  %v1281_v23 = vrot.slane %v1280_v6, 1  ;;  %v1289_v17 = vrot.slane %v1173_v7, 4  ;;  %v2549_v5 = vadd.f32 %v2548_v62, %v2536_v15 }
 0x17d   :  { %2833 = vmatmul.bf16.vlgmr.msra.gmra.mxu3 %v4905_v4 }
 0x17e   :  { %v1282_v28 = vmax.f32 %v1280_v6, %v1281_v23  ;;  %v1290_v61 = vmax.f32 %v1173_v7, %v1289_v17 }
 0x17f   :  { %v2561_v53 = vpop.f32.mrf.mxu2  ;;  %v2537_v41 = vpop.f32.mrf.mxu0 }
 0x180   :  { %v1291_v18 = vrot.slane %v1290_v61, 2  ;;  %v2574_v40 = vpop.f32.mrf.mxu3  ;;  %v1334_v58 = vsel %vm1325_vm5, %v1282_v28, %v1333_v8  ;;  %v2550_v10 = vpop.f32.mrf.mxu1  ;;  %v2562_v19 = vadd.f32 %v2561_v53, %v2549_v5  ;;  %v1540_v5 = vperm.slane %v4989_v36, 3 }
 0x182   :  { %v1292_v4 = vmax.f32 %v1290_v61, %v1291_v18  ;;  %v2575_v48 = vadd.f32 %v2574_v40, %v2562_v19 }
 0x184   :  { %v1293_v2 = vrot.slane %v1292_v4, 1 }
 0x186   :  { %v1294_v42 = vmax.f32 %v1292_v4, %v1293_v2 }
 0x187   :  { %v2563_v12 = vpop.f32.mrf.mxu2  ;;  %v2587_v9 = vpop.f32.mrf.mxu0 }
 0x188   :  { %v2576_v34 = vpop.f32.mrf.mxu3  ;;  %v1335_v38 = vsel %vm1327_vm6, %v1294_v42, %v1334_v58  ;;  %v2588_v14 = vadd.f32 %v2587_v9, %v2575_v48  ;;  %v2600_v39 = vpop.f32.mrf.mxu1 }
 0x189   :  { %1339 = vst [vmem:[#allocation11 + $0x8] sm:$0xff] %v1335_v38 }
 0x18a   :  { %2901 = dma.vmem_to_hbm [thread:$0]  %s2897_s29, 256, %s2899_s9, [#allocation4]   ;;  %v2601_v43 = vadd.f32 %v2600_v39, %v2588_v14 }
 0x18c   :  { %2838 = vst [vmem:[#allocation12] sm:$0xff] %v2601_v43 }
 0x18f   :  { %v2613_v57 = vpop.f32.mrf.mxu2  ;;  %v2589_v1 = vpop.f32.mrf.mxu0 }
 0x190   :  { %v2626_v24 = vpop.f32.mrf.mxu3  ;;  %v2602_v26 = vpop.f32.mrf.mxu1  ;;  %v2614_v47 = vadd.f32 %v2613_v57, %v1538_v11 }
 0x192   :  { %v2627_v44 = vadd.f32 %v2626_v24, %v2614_v47 }
 0x197   :  { %v2615_v21 = vpop.f32.mrf.mxu2  ;;  %v2639_v29 = vpop.f32.mrf.mxu0 }
 0x198   :  { %v2628_v31 = vpop.f32.mrf.mxu3  ;;  %v2640_v20 = vadd.f32 %v2639_v29, %v2627_v44  ;;  %v2652_v25 = vpop.f32.mrf.mxu1 }
 0x19a   :  { %v2653_v30 = vadd.f32 %v2652_v25, %v2640_v20 }
 0x19f   :  { %v2665_v32 = vpop.f32.mrf.mxu2  ;;  %v2641_v16 = vpop.f32.mrf.mxu0 }
 0x1a0   :  { %v2666_v13 = vadd.f32 %v2665_v32, %v2653_v30  ;;  %v2678_v33 = vpop.f32.mrf.mxu3  ;;  %v2654_v55 = vpop.f32.mrf.mxu1 }
 0x1a2   :  { %v2679_v37 = vadd.f32 %v2678_v33, %v2666_v13 }
 0x1a4   :  { %2839 = vst [vmem:[#allocation12 + $0x8] sm:$0xff] %v2679_v37 }
 0x1a7   :  { %v2667_v35 = vpop.f32.mrf.mxu2 }
 0x1a8   :  { %v2680_v46 = vpop.f32.mrf.mxu3 }
 0x1b7   :  { %v2691_v60 = vpop.f32.mrf.mxu0 }
 0x1b8   :  { %v2704_v51 = vpop.f32.mrf.mxu1  ;;  %v2692_v3 = vadd.f32 %v2691_v60, %v1539_v59 }
 0x1ba   :  { %v2705_v8 = vadd.f32 %v2704_v51, %v2692_v3 }
 0x1bf   :  { %v2717_v0 = vpop.f32.mrf.mxu2  ;;  %v2693_v22 = vpop.f32.mrf.mxu0 }
 0x1c0   :  { %v2730_v56 = vpop.f32.mrf.mxu3  ;;  %v2706_v54 = vpop.f32.mrf.mxu1  ;;  %v2718_v52 = vadd.f32 %v2717_v0, %v2705_v8 }
 0x1c2   :  { %v2731_v49 = vadd.f32 %v2730_v56, %v2718_v52 }
 0x1c7   :  { %v2719_v50 = vpop.f32.mrf.mxu2 }
 0x1c8   :  { %v2732_v45 = vpop.f32.mrf.mxu3 }
 0x1d7   :  { %v2743_v27 = vpop.f32.mrf.mxu0 }
 0x1d8   :  { %v2744_v63 = vadd.f32 %v2743_v27, %v2731_v49  ;;  %v2756_v62 = vpop.f32.mrf.mxu1 }
 0x1da   :  { %v2757_v6 = vadd.f32 %v2756_v62, %v2744_v63 }
 0x1dc   :  { %2840 = vst [vmem:[#allocation12 + $0x10] sm:$0xff] %v2757_v6 }
 0x1df   :  { %v2769_v7 = vpop.f32.mrf.mxu2  ;;  %v2745_v23 = vpop.f32.mrf.mxu0 }
 0x1e0   :  { %v2782_v15 = vpop.f32.mrf.mxu3  ;;  %v2758_v17 = vpop.f32.mrf.mxu1  ;;  %v2770_v53 = vadd.f32 %v2769_v7, %v1540_v5 }
 0x1e2   :  { %v2783_v18 = vadd.f32 %v2782_v15, %v2770_v53 }
 0x1e7   :  { %v2771_v28 = vpop.f32.mrf.mxu2 }
 0x1e8   :  { %v2784_v61 = vpop.f32.mrf.mxu3 }
 0x1f7   :  { %v2795_v40 = vpop.f32.mrf.mxu0 }
 0x1f8   :  { %v2808_v41 = vpop.f32.mrf.mxu1  ;;  %v2796_v58 = vadd.f32 %v2795_v40, %v2783_v18 }
 0x1fa   :  { %v2809_v10 = vadd.f32 %v2808_v41, %v2796_v58 }
 0x1ff   :  { %v2821_v4 = vpop.f32.mrf.mxu2  ;;  %v2797_v42 = vpop.f32.mrf.mxu0 }
 0x200   :  { %v2822_v19 = vadd.f32 %v2821_v4, %v2809_v10  ;;  %v2834_v2 = vpop.f32.mrf.mxu3  ;;  %v2810_v48 = vpop.f32.mrf.mxu1 }
 0x202   :  { %v2835_v12 = vadd.f32 %v2834_v2, %v2822_v19 }
 0x204   :  { %2841 = vst [vmem:[#allocation12 + $0x18] sm:$0xff] %v2835_v12 }
 0x205   :  { %2912 = dma.vmem_to_hbm [thread:$0]  %s2908_s10, 512, %s2910_s13, [#allocation13]  }
 0x207   :  { %v2823_v36 = vpop.f32.mrf.mxu2 }
 0x208   :  { %v2836_v34 = vpop.f32.mrf.mxu3 }
 0x209   :  { %4673 = dma.done.wait [#allocation4], 256  }
 0x20a   :  { %4674 = vsyncadd [#allocation4], 4294967040 }
 0x20b   :  { %4675 = dma.done.wait [#allocation13], 512  }
 0x20c   :  { %4676 = vsyncadd [#allocation13], 4294966784 }
 0x20d   :  { %2921 = vsyncpa [#allocation3], 1 }
 0x20e   :  { %2922 = vsyncpa [#allocation6], 1 }
 0x20f   :  { %2923 = vsyncpa [#allocation9], 1 }
 0x210   :  { %2924 = vsyncpa [#allocation4], 1 }
 0x211   :  { %2925 = vsyncpa [#allocation13], 1 }

</bundles_post_ra>
